<compile_context>
chip_gen: v7x
topology: tpu7x:2x2x1
jax: 0.10.0
libtpu: 0.0.40
codegen_flags: <defaults>
</compile_context>

<pallas_src>
import jax
import jax.numpy as jnp
from jax import lax
from jax.experimental import pallas as pl
from jax.experimental.pallas import tpu as pltpu


# ----------------------------------------------------------------------------
# Pallas kernel: grid = (i row-tiles [parallel], j particle-tiles [arbitrary]).
# ----------------------------------------------------------------------------
def composition_pair_kernel(params_ref,            # SMEM (8,)   f32 constants
                            lhsa_ref,              # VMEM (TM,16) r^2 LHS (tile i)
                            lhsb_ref,              # VMEM (TM,16) dv.dr LHS (tile i)
                            thr_ref,               # VMEM (TM,1)  guard threshold
                            pack_ref,              # VMEM (16,TN) packed all-j slab
                            out_ref,               # VMEM (1,2,128) per-i-tile partials
                            rho_acc, div_acc):     # VMEM (TM,1) scratch accumulators
    j = pl.program_id(1)

    @pl.when(j == 0)
    def _init():
        rho_acc[...] = jnp.zeros_like(rho_acc)
        div_acc[...] = jnp.zeros_like(div_acc)

    inv_h = params_ref[0]
    two_sigma = params_ref[1]        # 2 * 8/(pi h^3)
    eight_sigma = params_ref[2]      # 8 * sigma
    six_sig_h = params_ref[3]        # 6 * sigma / h
    t24_sig_h = params_ref[4]        # 24 * sigma / h
    vol = params_ref[5]

    pack = pack_ref[...]             # (16, TN)

    # MXU: r^2 and (v_j - v_i).(r_i - r_j) straight out of two K=16 matmuls
    # (ri2 / -v_i.r_i are folded into the LHS via the constant-ones pack row).
    r2 = jnp.dot(lhsa_ref[...], pack, preferred_element_type=jnp.float32)
    dot_vd = jnp.dot(lhsb_ref[...], pack, preferred_element_type=jnp.float32)

    r2 = jnp.maximum(r2, 0.0)                      # clamp cancellation garbage
    inv_r = lax.rsqrt(jnp.maximum(r2, 1e-30))      # EUP slot
    q = (r2 * inv_r) * inv_h                       # q = r / h

    # Branch-free clamped 3-D cubic spline (zero outside support == cutoff).
    t1 = jnp.maximum(1.0 - q, 0.0)
    t2 = jnp.maximum(0.5 - q, 0.0)
    t1sq = t1 * t1
    t2sq = t2 * t2
    w = two_sigma * (t1sq * t1) - eight_sigma * (t2sq * t2)
    dw = t24_sig_h * t2sq - six_sig_h * t1sq

    # Guard against catastrophic cancellation in the r^2 expansion for
    # (near-)coincident pairs: reference zeroes these via inv_r = 0 at r = 0.
    g = jnp.where(r2 > thr_ref[...], dw * inv_r * dot_vd, 0.0)

    rho_acc[...] += jnp.sum(w, axis=1, keepdims=True)   # (TM,1)
    div_acc[...] += jnp.sum(g, axis=1, keepdims=True)   # (TM,1)

    @pl.when(j == pl.num_programs(1) - 1)
    def _finalize():
        # rho = rho_0*vol*sum(w) ; cmp = rho/rho_0 - 1 = vol*sum(w) - 1
        cmp = vol * rho_acc[...] - 1.0
        div = vol * div_acc[...]
        s2 = jnp.sum(jnp.abs(cmp))
        s3 = jnp.sum(jnp.abs(div))
        out_ref[:, 0:1, :] = jnp.broadcast_to(s2, (1, 1, 128))
        out_ref[:, 1:2, :] = jnp.broadcast_to(s3, (1, 1, 128))


# ----------------------------------------------------------------------------
# Wrapper: standardizer inverse, boundary-masked update, packing, layout.
# ----------------------------------------------------------------------------
def composition_loss(pred, y_std, mid_pos, mid_vel, *, num_boundary, h, rho_0,
                     vol, dt, alpha, beta, gamma, std_y, mean_y,
                     tile_m=256, tile_n=2048, eps_guard=1e-5):
    n, d = pred.shape
    assert d == 3
    tile_m = min(tile_m, n)
    tile_n = min(tile_n, n)
    assert n % tile_m == 0 and n % tile_n == 0
    assert tile_m == n or tile_m % 8 == 0
    assert tile_n == n or tile_n % 128 == 0

    # Prefer an even number of i-tiles so both v7x TensorCores get equal work
    # (no-op on single-TC v5e/v6e).
    if (n // tile_m) % 2 == 1 and (n // tile_m) > 1 and tile_m % 16 == 0:
        tile_m //= 2

    f32 = jnp.float32
    pred = pred.astype(f32)
    y_std = y_std.astype(f32)
    mid_pos = mid_pos.astype(f32)
    mid_vel = mid_vel.astype(f32)

    # loss1 = mean(sum((y - pred)^2, axis=1)) : plain XLA reduction (O(3N)).
    loss1 = jnp.mean(jnp.sum((y_std - pred) ** 2, axis=1))

    # batch.y = standardizer.inverse_y(batch.y)
    y_inv = y_std * std_y + mean_y
    # batch.mid_pos[nb:] += y[nb:] ; batch.mid_vel[nb:] += y[nb:] / dt
    pos = mid_pos.at[num_boundary:].add(y_inv[num_boundary:])
    vel = mid_vel.at[num_boundary:].add(y_inv[num_boundary:] / dt)

    # Both pairwise terms are translation invariant -> centroid-shift to keep
    # the |r_i|^2 - 2 r_i.r_j + |r_j|^2 expansion well conditioned in f32.
    pos_c = pos - jnp.mean(pos, axis=0, keepdims=True)
    vel_c = vel - jnp.mean(vel, axis=0, keepdims=True)

    ri2 = jnp.sum(pos_c * pos_c, axis=1, keepdims=True)     # |r_i|^2   (N,1)
    viri = jnp.sum(pos_c * vel_c, axis=1, keepdims=True)    # v_i.r_i   (N,1)
    ones = jnp.ones((n, 1), f32)
    z1 = jnp.zeros((n, 1), f32)
    z3 = jnp.zeros((n, 3), f32)
    z7 = jnp.zeros((n, 7), f32)

    # LHS slabs (hoisted out of the kernel), K = 16:
    #   pack rows: [pos_j (3); |r_j|^2; vel_j (3); v_j.r_j; 1; 0 x 7]
    lhs_a = jnp.concatenate([-2.0 * pos_c, ones, z3, z1, ri2, z7], axis=1)  # (N,16)
    lhs_b = jnp.concatenate([vel_c, z1, pos_c, -ones, -viri, z7], axis=1)   # (N,16)
    thr = (eps_guard * ri2).astype(f32)                                     # (N,1)

    packed = jnp.concatenate(
        [pos_c.T, ri2.T, vel_c.T, viri.T, jnp.ones((1, n), f32),
         jnp.zeros((7, n), f32)], axis=0).astype(f32)                       # (16,N)

    sigma = 8.0 / (jnp.pi * h ** 3)
    params = jnp.array([1.0 / h, 2.0 * sigma, 8.0 * sigma,
                        6.0 * sigma / h, 24.0 * sigma / h, vol, 0.0, 0.0],
                       dtype=f32)

    ni = n // tile_m
    nj = n // tile_n
    i_spec16 = pl.BlockSpec((tile_m, 16), lambda i, j: (i, 0))

    partials = pl.pallas_call(
        composition_pair_kernel,
        out_shape=jax.ShapeDtypeStruct((ni, 2, 128), jnp.float32),
        grid=(ni, nj),
        in_specs=[
            pl.BlockSpec(memory_space=pltpu.MemorySpace.SMEM),     # params
            i_spec16,                                              # lhs_a (tile i)
            i_spec16,                                              # lhs_b (tile i)
            pl.BlockSpec((tile_m, 1), lambda i, j: (i, 0)),        # guard threshold
            pl.BlockSpec((16, tile_n), lambda i, j: (0, j)),       # packed (all j)
        ],
        out_specs=pl.BlockSpec((1, 2, 128), lambda i, j: (i, 0, 0)),
        scratch_shapes=[pltpu.VMEM((tile_m, 1), jnp.float32),
                        pltpu.VMEM((tile_m, 1), jnp.float32)],
        compiler_params=pltpu.CompilerParams(
            dimension_semantics=("parallel", "arbitrary")),
    )(params, lhs_a, lhs_b, thr, packed)

    loss2 = jnp.sum(partials[:, 0, 0]) / n
    loss3 = jnp.sum(partials[:, 1, 0]) / n
    return alpha * loss1 + beta * loss2 + gamma * loss3


# ----------------------------------------------------------------------------
# Pure-JAX reference (same math, dense) for a correctness check.
# ----------------------------------------------------------------------------
def reference_loss(pred, y_std, mid_pos, mid_vel, *, num_boundary, h, rho_0,
                   vol, dt, alpha, beta, gamma, std_y, mean_y):
    loss1 = jnp.mean(jnp.sum((y_std - pred) ** 2, axis=1))
    y = y_std * std_y + mean_y
    mid_pos = mid_pos.at[num_boundary:].add(y[num_boundary:])
    mid_vel = mid_vel.at[num_boundary:].add(y[num_boundary:] / dt)

    diff = mid_pos[:, None, :] - mid_pos[None, :, :]
    r = jnp.sqrt(jnp.sum(diff ** 2, axis=-1))
    adj = r <= h
    q = r / h
    sigma = 8.0 / (jnp.pi * h ** 3)
    omq = 1.0 - q
    w = jnp.where(q <= 0.5, sigma * (6.0 * (q ** 3 - q ** 2) + 1.0),
                  jnp.where(q <= 1.0, sigma * 2.0 * omq ** 3, 0.0))
    w = jnp.where(adj, w, 0.0)
    rho = rho_0 * vol * jnp.sum(w, axis=1)
    loss2 = jnp.mean(jnp.abs(rho / rho_0 - 1.0))

    dw = jnp.where(q <= 0.5, (sigma / h) * (6.0 * q * (3.0 * q - 2.0)),
                   jnp.where(q <= 1.0, -(sigma / h) * 6.0 * omq ** 2, 0.0))
    dw = jnp.where(adj, dw, 0.0)
    inv_r = jnp.where(r > 0.0, 1.0 / jnp.maximum(r, 1e-30), 0.0)
    dv = mid_vel[None, :, :] - mid_vel[:, None, :]
    div = vol * jnp.sum(dw * inv_r * jnp.sum(dv * diff, axis=-1), axis=1)
    loss3 = jnp.mean(jnp.abs(div))
    return alpha * loss1 + beta * loss2 + gamma * loss3


if __name__ == "__main__":
    key = jax.random.PRNGKey(0)
    k1, k2, k3, k4 = jax.random.split(key, 4)

    N, D = 512, 3
    num_boundary = 64
    h = 0.3            # interaction radius / smoothing length
    rho_0 = 1000.0
    vol = 0.02 ** 3 * 500.0
    dt = 0.01
    alpha, beta, gamma = 1.0, 0.5, 0.25
    std_y, mean_y = 0.01, 0.0     # deterministic Standardizer parameters

    mid_pos = jax.random.uniform(k1, (N, D), jnp.float32)             # box [0,1]^3
    mid_vel = 0.1 * jax.random.normal(k2, (N, D), jnp.float32)
    y_std = jax.random.normal(k3, (N, D), jnp.float32)                # standardized target
    pred = y_std + 0.1 * jax.random.normal(k4, (N, D), jnp.float32)   # model prediction

    kwargs = dict(num_boundary=num_boundary, h=h, rho_0=rho_0, vol=vol, dt=dt,
                  alpha=alpha, beta=beta, gamma=gamma, std_y=std_y, mean_y=mean_y)

    ref = jax.block_until_ready(
        reference_loss(pred, y_std, mid_pos, mid_vel, **kwargs))

    # Small tiles -> exercises the multi-i / multi-j accumulation path.
    out_small = jax.block_until_ready(
        composition_loss(pred, y_std, mid_pos, mid_vel,
                         tile_m=128, tile_n=256, **kwargs))
    # Default tiles -> single j-tile (collapsed reduction), even i-tile count.
    out_big = jax.block_until_ready(
        composition_loss(pred, y_std, mid_pos, mid_vel, **kwargs))

    assert jnp.isfinite(out_small) and jnp.isfinite(out_big), "non-finite loss"
    assert jnp.allclose(out_small, ref, rtol=1e-3, atol=1e-5), (out_small, ref)
    assert jnp.allclose(out_big, ref, rtol=1e-3, atol=1e-5), (out_big, ref)
    print("KERNEL_OK")
</pallas_src>

<mosaic_0001>
module attributes {stable_mosaic.version = 11 : i64} {
  func.func @composition_pair_kernel(%arg0: i32, %arg1: i32, %arg2: memref<8xf32, #tpu.memory_space<smem>>, %arg3: memref<128x16xf32, #tpu.memory_space<vmem>>, %arg4: memref<128x16xf32, #tpu.memory_space<vmem>>, %arg5: memref<128x1xf32, #tpu.memory_space<vmem>>, %arg6: memref<16x256xf32, #tpu.memory_space<vmem>>, %arg7: memref<1x2x128xf32, #tpu.memory_space<vmem>>, %arg8: memref<128x1xf32, #tpu.memory_space<vmem>>, %arg9: memref<128x1xf32, #tpu.memory_space<vmem>>) attributes {dimension_semantics = [#tpu.dimension_semantics<parallel>, #tpu.dimension_semantics<arbitrary>], iteration_bounds = array<i64: 4, 2>, scalar_prefetch = 0 : i64, scratch_operands = 2 : i64, tpu.core_type = #tpu.core_type<tc>, window_params = [{transform_indices = @transform_0, window_bounds = array<i64: 8>}, {transform_indices = @transform_1, window_bounds = array<i64: 128, 16>}, {transform_indices = @transform_2, window_bounds = array<i64: 128, 16>}, {transform_indices = @transform_3, window_bounds = array<i64: 128, 1>}, {transform_indices = @transform_4, window_bounds = array<i64: 16, 256>}, {transform_indices = @transform_5, window_bounds = array<i64: 1, 2, 128>}]} {
    %c0_i32 = arith.constant 0 : i32
    %0 = arith.cmpi eq, %arg1, %c0_i32 : i32
    %1 = arith.extui %0 : i1 to i32
    %c0_i32_0 = arith.constant 0 : i32
    %2 = arith.cmpi ne, %1, %c0_i32_0 : i32
    scf.if %2 {
      %cst_28 = arith.constant 0.000000e+00 : f32
      %64 = vector.broadcast %cst_28 : f32 to vector<128x1xf32>
      %c0_29 = arith.constant 0 : index
      %c0_30 = arith.constant 0 : index
      %65 = vector.load %arg8[%c0_29, %c0_30] : memref<128x1xf32, #tpu.memory_space<vmem>>, vector<128x1xf32>
      tpu.vector_store %arg8[%c0_29, %c0_30], %64 {strides = array<i32>} : memref<128x1xf32, #tpu.memory_space<vmem>>, vector<128x1xf32>,
      %cst_31 = arith.constant 0.000000e+00 : f32
      %66 = vector.broadcast %cst_31 : f32 to vector<128x1xf32>
      %c0_32 = arith.constant 0 : index
      %c0_33 = arith.constant 0 : index
      %67 = vector.load %arg9[%c0_32, %c0_33] : memref<128x1xf32, #tpu.memory_space<vmem>>, vector<128x1xf32>
      tpu.vector_store %arg9[%c0_32, %c0_33], %66 {strides = array<i32>} : memref<128x1xf32, #tpu.memory_space<vmem>>, vector<128x1xf32>,
    } else {
    }
    %c0 = arith.constant 0 : index
    %3 = memref.load %arg2[%c0] : memref<8xf32, #tpu.memory_space<smem>>
    %c1 = arith.constant 1 : index
    %4 = memref.load %arg2[%c1] : memref<8xf32, #tpu.memory_space<smem>>
    %c2 = arith.constant 2 : index
    %5 = memref.load %arg2[%c2] : memref<8xf32, #tpu.memory_space<smem>>
    %c3 = arith.constant 3 : index
    %6 = memref.load %arg2[%c3] : memref<8xf32, #tpu.memory_space<smem>>
    %c4 = arith.constant 4 : index
    %7 = memref.load %arg2[%c4] : memref<8xf32, #tpu.memory_space<smem>>
    %c5 = arith.constant 5 : index
    %8 = memref.load %arg2[%c5] : memref<8xf32, #tpu.memory_space<smem>>
    %c0_1 = arith.constant 0 : index
    %c0_2 = arith.constant 0 : index
    %9 = vector.load %arg6[%c0_1, %c0_2] : memref<16x256xf32, #tpu.memory_space<vmem>>, vector<16x256xf32>
    %c0_3 = arith.constant 0 : index
    %c0_4 = arith.constant 0 : index
    %10 = vector.load %arg3[%c0_3, %c0_4] : memref<128x16xf32, #tpu.memory_space<vmem>>, vector<128x16xf32>
    %cst = arith.constant dense<0.000000e+00> : vector<128x256xf32>
    %11 = tpu.matmul %10, %9, %cst {dimension_numbers = #tpu.dot_dimension_numbers<[1], [0], [0], [1], [0, 0, 1, 1], [], []>} : vector<128x16xf32>, vector<16x256xf32>, vector<128x256xf32> -> vector<128x256xf32>
    %c0_5 = arith.constant 0 : index
    %c0_6 = arith.constant 0 : index
    %12 = vector.load %arg4[%c0_5, %c0_6] : memref<128x16xf32, #tpu.memory_space<vmem>>, vector<128x16xf32>
    %cst_7 = arith.constant dense<0.000000e+00> : vector<128x256xf32>
    %13 = tpu.matmul %12, %9, %cst_7 {dimension_numbers = #tpu.dot_dimension_numbers<[1], [0], [0], [1], [0, 0, 1, 1], [], []>} : vector<128x16xf32>, vector<16x256xf32>, vector<128x256xf32> -> vector<128x256xf32>
    %cst_8 = arith.constant 0.000000e+00 : f32
    %14 = vector.broadcast %cst_8 : f32 to vector<128x256xf32>
    %15 = arith.maximumf %11, %14 : vector<128x256xf32>
    %cst_9 = arith.constant 1.000000e-30 : f32
    %16 = vector.broadcast %cst_9 : f32 to vector<128x256xf32>
    %17 = arith.maximumf %15, %16 : vector<128x256xf32>
    %18 = math.rsqrt %17 : vector<128x256xf32>
    %19 = arith.mulf %15, %18 : vector<128x256xf32>
    %20 = vector.broadcast %3 : f32 to vector<128x256xf32>
    %21 = arith.mulf %19, %20 : vector<128x256xf32>
    %cst_10 = arith.constant 1.000000e+00 : f32
    %22 = vector.broadcast %cst_10 : f32 to vector<128x256xf32>
    %23 = arith.subf %22, %21 : vector<128x256xf32>
    %cst_11 = arith.constant 0.000000e+00 : f32
    %24 = vector.broadcast %cst_11 : f32 to vector<128x256xf32>
    %25 = arith.maximumf %23, %24 : vector<128x256xf32>
    %cst_12 = arith.constant 5.000000e-01 : f32
    %26 = vector.broadcast %cst_12 : f32 to vector<128x256xf32>
    %27 = arith.subf %26, %21 : vector<128x256xf32>
    %cst_13 = arith.constant 0.000000e+00 : f32
    %28 = vector.broadcast %cst_13 : f32 to vector<128x256xf32>
    %29 = arith.maximumf %27, %28 : vector<128x256xf32>
    %30 = arith.mulf %25, %25 : vector<128x256xf32>
    %31 = arith.mulf %29, %29 : vector<128x256xf32>
    %32 = arith.mulf %30, %25 : vector<128x256xf32>
    %33 = vector.broadcast %4 : f32 to vector<128x256xf32>
    %34 = arith.mulf %33, %32 : vector<128x256xf32>
    %35 = arith.mulf %31, %29 : vector<128x256xf32>
    %36 = vector.broadcast %5 : f32 to vector<128x256xf32>
    %37 = arith.mulf %36, %35 : vector<128x256xf32>
    %38 = arith.subf %34, %37 : vector<128x256xf32>
    %39 = vector.broadcast %7 : f32 to vector<128x256xf32>
    %40 = arith.mulf %39, %31 : vector<128x256xf32>
    %41 = vector.broadcast %6 : f32 to vector<128x256xf32>
    %42 = arith.mulf %41, %30 : vector<128x256xf32>
    %43 = arith.subf %40, %42 : vector<128x256xf32>
    %c0_14 = arith.constant 0 : index
    %c0_15 = arith.constant 0 : index
    %44 = vector.load %arg5[%c0_14, %c0_15] : memref<128x1xf32, #tpu.memory_space<vmem>>, vector<128x1xf32>
    %45 = vector.broadcast %44 : vector<128x1xf32> to vector<128x256xf32>
    %46 = arith.cmpf ogt, %15, %45 : vector<128x256xf32>
    %47 = arith.mulf %43, %18 : vector<128x256xf32>
    %48 = arith.mulf %47, %13 : vector<128x256xf32>
    %cst_16 = arith.constant 0.000000e+00 : f32
    %49 = vector.broadcast %cst_16 : f32 to vector<128x256xf32>
    %50 = arith.select %46, %48, %49 : vector<128x256xi1>, vector<128x256xf32>
    %c0_17 = arith.constant 0 : index
    %c0_18 = arith.constant 0 : index
    %51 = vector.load %arg8[%c0_17, %c0_18] : memref<128x1xf32, #tpu.memory_space<vmem>>, vector<128x1xf32>
    %cst_19 = arith.constant dense<0.000000e+00> : vector<128xf32>
    %52 = vector.multi_reduction <add>, %38, %cst_19 [1] : vector<128x256xf32> to vector<128xf32>
    %53 = vector.shape_cast %52 : vector<128xf32> to vector<128x1xf32>
    %54 = arith.addf %51, %53 : vector<128x1xf32>
    %c0_20 = arith.constant 0 : index
    %c0_21 = arith.constant 0 : index
    %55 = vector.load %arg8[%c0_20, %c0_21] : memref<128x1xf32, #tpu.memory_space<vmem>>, vector<128x1xf32>
    tpu.vector_store %arg8[%c0_20, %c0_21], %54 {strides = array<i32>} : memref<128x1xf32, #tpu.memory_space<vmem>>, vector<128x1xf32>,
    %c0_22 = arith.constant 0 : index
    %c0_23 = arith.constant 0 : index
    %56 = vector.load %arg9[%c0_22, %c0_23] : memref<128x1xf32, #tpu.memory_space<vmem>>, vector<128x1xf32>
    %cst_24 = arith.constant dense<0.000000e+00> : vector<128xf32>
    %57 = vector.multi_reduction <add>, %50, %cst_24 [1] : vector<128x256xf32> to vector<128xf32>
    %58 = vector.shape_cast %57 : vector<128xf32> to vector<128x1xf32>
    %59 = arith.addf %56, %58 : vector<128x1xf32>
    %c0_25 = arith.constant 0 : index
    %c0_26 = arith.constant 0 : index
    %60 = vector.load %arg9[%c0_25, %c0_26] : memref<128x1xf32, #tpu.memory_space<vmem>>, vector<128x1xf32>
    tpu.vector_store %arg9[%c0_25, %c0_26], %59 {strides = array<i32>} : memref<128x1xf32, #tpu.memory_space<vmem>>, vector<128x1xf32>,
    %c1_i32 = arith.constant 1 : i32
    %61 = arith.cmpi eq, %arg1, %c1_i32 : i32
    %62 = arith.extui %61 : i1 to i32
    %c0_i32_27 = arith.constant 0 : i32
    %63 = arith.cmpi ne, %62, %c0_i32_27 : i32
    scf.if %63 {
      %c0_28 = arith.constant 0 : index
      %c0_29 = arith.constant 0 : index
      %64 = vector.load %arg8[%c0_28, %c0_29] : memref<128x1xf32, #tpu.memory_space<vmem>>, vector<128x1xf32>
      %65 = vector.broadcast %8 : f32 to vector<128x1xf32>
      %66 = arith.mulf %65, %64 : vector<128x1xf32>
      %cst_30 = arith.constant 1.000000e+00 : f32
      %67 = vector.broadcast %cst_30 : f32 to vector<128x1xf32>
      %68 = arith.subf %66, %67 : vector<128x1xf32>
      %c0_31 = arith.constant 0 : index
      %c0_32 = arith.constant 0 : index
      %69 = vector.load %arg9[%c0_31, %c0_32] : memref<128x1xf32, #tpu.memory_space<vmem>>, vector<128x1xf32>
      %70 = vector.broadcast %8 : f32 to vector<128x1xf32>
      %71 = arith.mulf %70, %69 : vector<128x1xf32>
      %72 = math.absf %68 : vector<128x1xf32>
      %73 = vector.shape_cast %72 : vector<128x1xf32> to vector<1x128x1xf32>
      %cst_33 = arith.constant dense<0.000000e+00> : vector<1xf32>
      %74 = vector.multi_reduction <add>, %73, %cst_33 [1, 2] : vector<1x128x1xf32> to vector<1xf32>
      %75 = vector.shape_cast %74 : vector<1xf32> to vector<1x1x1xf32>
      %76 = vector.extract %75[0, 0, 0] : f32 from vector<1x1x1xf32>
      %77 = math.absf %71 : vector<128x1xf32>
      %78 = vector.shape_cast %77 : vector<128x1xf32> to vector<1x128x1xf32>
      %cst_34 = arith.constant dense<0.000000e+00> : vector<1xf32>
      %79 = vector.multi_reduction <add>, %78, %cst_34 [1, 2] : vector<1x128x1xf32> to vector<1xf32>
      %80 = vector.shape_cast %79 : vector<1xf32> to vector<1x1x1xf32>
      %81 = vector.extract %80[0, 0, 0] : f32 from vector<1x1x1xf32>
      %82 = vector.broadcast %76 : f32 to vector<1x1x128xf32>
      %c0_35 = arith.constant 0 : index
      %c0_36 = arith.constant 0 : index
      %c0_37 = arith.constant 0 : index
      %83 = vector.load %arg7[%c0_35, %c0_36, %c0_37] : memref<1x2x128xf32, #tpu.memory_space<vmem>>, vector<1x1x128xf32>
      tpu.vector_store %arg7[%c0_35, %c0_36, %c0_37], %82 {strides = array<i32>} : memref<1x2x128xf32, #tpu.memory_space<vmem>>, vector<1x1x128xf32>,
      %84 = vector.broadcast %81 : f32 to vector<1x1x128xf32>
      %c0_38 = arith.constant 0 : index
      %c1_39 = arith.constant 1 : index
      %c0_40 = arith.constant 0 : index
      %85 = vector.load %arg7[%c0_38, %c1_39, %c0_40] : memref<1x2x128xf32, #tpu.memory_space<vmem>>, vector<1x1x128xf32>
      tpu.vector_store %arg7[%c0_38, %c1_39, %c0_40], %84 {strides = array<i32>} : memref<1x2x128xf32, #tpu.memory_space<vmem>>, vector<1x1x128xf32>,
    } else {
    }
    return
  }
  func.func @transform_0(%arg0: i32, %arg1: i32) -> i32 {
    %c0_i32 = arith.constant 0 : i32
    %c0_i32_0 = arith.constant 0 : i32
    return %c0_i32 : i32
  }
  func.func @transform_1(%arg0: i32, %arg1: i32) -> (i32, i32) {
    %c0_i32 = arith.constant 0 : i32
    %c0_i32_0 = arith.constant 0 : i32
    return %arg0, %c0_i32 : i32, i32
  }
  func.func @transform_2(%arg0: i32, %arg1: i32) -> (i32, i32) {
    %c0_i32 = arith.constant 0 : i32
    %c0_i32_0 = arith.constant 0 : i32
    return %arg0, %c0_i32 : i32, i32
  }
  func.func @transform_3(%arg0: i32, %arg1: i32) -> (i32, i32) {
    %c0_i32 = arith.constant 0 : i32
    %c0_i32_0 = arith.constant 0 : i32
    return %arg0, %c0_i32 : i32, i32
  }
  func.func @transform_4(%arg0: i32, %arg1: i32) -> (i32, i32) {
    %c0_i32 = arith.constant 0 : i32
    %c0_i32_0 = arith.constant 0 : i32
    return %c0_i32, %arg1 : i32, i32
  }
  func.func @transform_5(%arg0: i32, %arg1: i32) -> (i32, i32, i32) {
    %c0_i32 = arith.constant 0 : i32
    %c0_i32_0 = arith.constant 0 : i32
    %c0_i32_1 = arith.constant 0 : i32
    return %arg0, %c0_i32, %c0_i32_0 : i32, i32, i32
  }
}

</mosaic_0001>

<bundles_post_ra>
// kernel: tpu_custom_call.1
= control target key start
LH: loop header
LB: loop body
LE: loop exit
PB: predicated region body
PF: predicated region fallthrough
CT: control target
= control target key end

     0   :  { %s4216_s0 = inlined_call_operand.vmem [shape: f32[8], index: 0, kind: input, shape index: {}]   ;;  %s4217_s1 = inlined_call_operand.vmem [shape: f32[512,16], index: 1, kind: input, shape index: {}]   ;;  %s4218_s2 = inlined_call_operand.vmem [shape: f32[512,16], index: 2, kind: input, shape index: {}]   ;;  %s4219_s3 = inlined_call_operand.vmem [shape: f32[512,1], index: 3, kind: input, shape index: {}]   ;;  %s4220_s4 = inlined_call_operand.vmem [shape: f32[16,512], index: 4, kind: input, shape index: {}]   ;;  %s4221_s5 = inlined_call_operand.hbm [shape: f32[4,2,128], index: 5, kind: output, shape index: {}]  }
   0x1   :  { %4304 = sst [smem:[#allocation91_spill]] %s4216_s0 }
   0x2   :  { %4305 = sst [smem:[#allocation92_spill]] %s4220_s4 }
   0x3   :  { %10 = vsyncpa [#allocation6], 0 }
   0x4   :  { %11 = vsyncpa [#allocation5], 0 }
   0x5   :  { %13 = vsyncpa [#allocation5 + $0x1], 0  ;;  %s2632_s18 = smov 0   ;;  %s2634_s19 = smov 0  }
   0x6   :  { %s2636_s20 = smov 0   ;;  %s2638_s21 = smov 0  }
   0x7   :  { %s2640_s22 = smov 0   ;;  %s2642_s23 = smov 0  }
   0x8   :  { %s2644_s24 = smov 0   ;;  %s2646_s25 = smov 0  }
   0x9   :  { %s2648_s26 = smov 0   ;;  %s2650_s27 = smov 0  }
   0xa LB: > { %4306 = sst [smem:[#allocation11_spill]] %s2591_s26  ;;  %s2209_s28 = sadd.s32 4294967295, %s2595_s27   ;;  %s2595_s27 = sphi %s2650_s27, %s19_s27   ;;  %s2591_s26 = sphi %s2648_s26, %s4524_s26   ;;  %s2587_s25 = sphi %s2646_s25, %s4531_s25   ;;  %s2583_s24 = sphi %s2644_s24, %s4522_s24   ;;  %s2579_s23 = sphi %s2642_s23, %s4530_s23   ;;  %s2575_s22 = sphi %s2640_s22, %s4529_s22   ;;  %s2571_s21 = sphi %s2638_s21, %s4528_s21   ;;  %s2567_s20 = sphi %s2636_s20, %s4527_s20   ;;  %s2563_s19 = sphi %s2634_s19, %s4526_s19   ;;  %s2559_s18 = sphi %s2632_s18, %s4525_s18  }
   0xb   : > { %s2210_s29 = sadd.s32 4294967294, %s2595_s27   ;;  %s28_s30 = sadd.s32 1, %s2587_s25 }
   0xc   : > { %s31_s6 = sadd.s32 1, %s2591_s26  ;;  %p29_p0 = scmp.ge.s32.totalorder %s28_s30, 2 }
   0xd   : > { %s137_s7 = sadd.s32 1, %s2575_s22  ;;  %p144_p1 = scmp.ne.s32.totalorder %s2575_s22, %s2571_s21 }
   0xe   : > { %p145_p2 = scmp.eq.s32.totalorder %s2595_s27, 0  ;;  %s4533_s30 = smov (%p29_p0, %s28_s30), 0 }
   0xf   : > { %4307 = sst [smem:[#allocation12_spill]] %s4533_s30  ;;  %s4535_s6 = smov (!%p29_p0, %s31_s6), %s2591_s26 }
  0x10   : > { %s134_s8 = ssub.s32 %s2587_s25, %s4533_s30  ;;  %p2695_p3 = por %p145_p2, %p144_p1 }
  0x11   : > { %p33_p4 = scmp.ge.s32.totalorder %s4535_s6, 4  ;;  %p135_p5 = scmp.eq.s32.totalorder %s134_s8, 0 }
  0x12   : > { %s163_s10 = sadd.s32 1, %s2567_s20  ;;  %p173_p6 = scmp.ne.s32.totalorder %s2567_s20, %s2563_s19 }
  0x13   : > { %s4537_s6 = smov (%p33_p4, %s4535_s6), 0  ;;  %p174_p7 = scmp.eq.s32.totalorder %s2209_s28, 7 }
  0x14   : > { %4309 = sst [smem:[#allocation13_spill]] %s4537_s6  ;;  %s160_s12 = ssub.s32 %s2591_s26, %s4537_s6 }
  0x15   : > { %s2705_s11 = scalar_select %p135_p5, %s2575_s22, %s137_s7  }
  0x16   : > { %p161_p8 = scmp.eq.s32.totalorder %s160_s12, 0  ;;  %p179_p9 = scmp.ne.s32.totalorder %s2563_s19, %s2559_s18 }
  0x17   : > { %p2711_p10 = por %p174_p7, %p173_p6  ;;  %p180_p11 = scmp.eq.s32.totalorder %s2210_s29, 7 }
  0x18   : > { %s2716_s14 = scalar_select %p161_p8, %s2567_s20, %s163_s10  }
  0x19   : > { %s4310_s13 = scalar_select %p2711_p10, 1, 0 }
  0x1a   : > { %p2718_p12 = por %p180_p11, %p179_p9  ;;  %p2211_p13 = scmp.ge.s32.totalorder %s2595_s27, 1 }
  0x1b   : > { %p187_p0 = scmp.lt.s32.totalorder %s2595_s27, 9  ;;  %p2724_p1 = scmp.eq.s32.totalorder %s2209_s28, 0 }
  0x1c   : > { %s4311_s15 = scalar_select %p2718_p12, 1, 0 }
  0x1d   : > { %p2728_p2 = pnand %p2211_p13, %p187_p0  ;;  %s4314_s0 = sld [smem:[#allocation91_spill]] }
  0x1f   : > { %p2305_p4 = pneg %p2728_p2 }
  0x21   : > { %p2306_p5 = pnand %p2724_p1, %p2305_p4 }
  0x23   : > { %s200_s29 = sshll.u32 %s4314_s0, 4  ;;  %p2468_p7 = pneg %p2306_p5  ;;  %s201_s29 = int_to_ptr.vmem [resolvable:$true] %s200_s29 }
  0x24   : > { %s2466_s10 = scalar_lea.vmem %s201_s29, 16  ;;  %p2474_p11 = scmp.lt.s32.totalorder %s201_s29, %s201_s29 }
  0x25   : > { %p2467_p6 = scmp.ne.s32.totalorder %s201_s29, %s2466_s10  ;;  %p2475_p13 = scmp.lt.s32.totalorder %s2466_s10, %s2466_s10 }
  0x27   : > { %p2469_p8 = pnand %p2468_p7, %p2467_p6  ;;  %p2476_p0 = por %p2475_p13, %p2474_p11 }
  0x29   : > { %p2470_p9 = pneg %p2469_p8 }
  0x2b   : > { %p2477_p12 = pnand %p2476_p0, %p2470_p9 }
  0x2d   : > { %2480 = shalt.err (!%p2477_p12)
}
  0x2e   : > { %s2597_s28 = smov [#allocation4]   ;;  %p2213_p10 = scmp.ge.s32.totalorder %s2595_s27, 8 }
  0x2f   : > { %2308 = dma.vmem_to_smem (!%p2306_p5), %s201_s29, 16, %s2597_s28, [#allocation6]  }
  0x30   : > { %207 = sbr.rel (%p2213_p10) target bundleno = 67 (0x43), region = 20 }
  0x37   : > { %237 = sbr.rel (!%p2695_p3) target bundleno = 67 (0x43), region = 36  ;;  %s239_s12 = sand.u32 (%p2695_p3), 1, %s2575_s22  }
  0x38   : > { %s2286_s7 = sshll.u32 (%p2695_p3), %s2587_s25, 4  ;;  %s2214_s8 = sshll.u32 (%p2695_p3), %s239_s12, 5 }
  0x39   : > { %s4315_s4 = sld [smem:[#allocation92_spill]] (%p2695_p3)  ;;  %s241_s30 = scalar_lea.vmem (%p2695_p3), [#allocation7], %s2214_s8 }
  0x3f   : > { %s244_s10 = scalar_lea.vmem %s4315_s4, %s2286_s7 }
  0x40   : > { %v257_v0 = vld [vmem:[%s244_s10] sm:$0xff]  ;;  %v259_v1 = vld [vmem:[%s244_s10 + $0x8] sm:$0xff] }
  0x41   : > { %v261_v2 = vld [vmem:[%s244_s10 + $0x20] sm:$0xff]  ;;  %258 = vst [vmem:[%s241_s30] sm:$0xff] %v257_v0  ;;  %260 = vst [vmem:[%s241_s30 + $0x8] sm:$0xff] %v259_v1  ;;  %v263_v3 = vld [vmem:[%s244_s10 + $0x28] sm:$0xff] }
  0x42   : > { %262 = vst [vmem:[%s241_s30 + $0x10] sm:$0xff] %v261_v2  ;;  %264 = vst [vmem:[%s241_s30 + $0x18] sm:$0xff] %v263_v3 }
  0x43 PF: > { %273 = sbr.rel (%p2728_p2) target bundleno = 937 (0x3a9), region = 59 }
  0x4a   : > { %2550 = dma.done.wait (%p2724_p1), [#allocation6], 16  }
  0x4b   : > { %2552 = vsyncadd (%p2724_p1), [#allocation6], 4294967280  ;;  %s280_s0 = sand.u32 1, %s2571_s21  }
  0x4c   : > { %s2219_s6 = sshll.u32 %s280_s0, 5 }
  0x4d   : > { %s2754_s9 = scalar_lea.vmem [#allocation7], %s2219_s6 }
  0x4e   : > { %286 = sfence }
  0x4f   : > { %s320_s30 = sand.u32 1, %s2563_s19   ;;  %s2221_s29 = sshll.u32 %s2583_s24, 4 }
  0x50   : > { %s2220_s17 = sshll.u32 %s320_s30, 1  ;;  %p324_p3 = scmp.lt.s32.totalorder %s2221_s29, 63 }
  0x51   : > { %s2775_s26 = scalar_lea.vmem [#allocation8], %s2220_s17  ;;  %p2227_p10 = scmp.ne.s32.totalorder %s2579_s23, 0 }
  0x52   : > { %s4539_s29 = smov (!%p324_p3, %s2221_s29), 63  ;;  %vm346_vm0 = vcmask (!%p2227_p10), 7168   ;;  %v2598_v4 = vmov (!%p2227_p10), 0.0  }
  0x53   : > { %s2222_s28 = sshll.u32 %s4539_s29, 3  ;;  %345 = sbr.rel (%p2227_p10) target bundleno = 99 (0x63), region = 71  ;;  %347 = vst.msk [vmem:[#allocation2] sm:$0xff] (!%p2227_p10), %vm346_vm0, %v2598_v4  ;;  %348 = vst.msk [vmem:[#allocation2 + $0x8] sm:$0xff] (!%p2227_p10), %vm346_vm0, %v2598_v4 }
  0x54   : > { %s2763_s16 = scalar_lea.vmem %s4217_s1, %s2222_s28  ;;  %s2768_s10 = scalar_lea.vmem %s4218_s2, %s2222_s28  ;;  %349 = vst.msk [vmem:[#allocation2 + $0x10] sm:$0xff] (!%p2227_p10), %vm346_vm0, %v2598_v4  ;;  %350 = vst.msk [vmem:[#allocation2 + $0x18] sm:$0xff] (!%p2227_p10), %vm346_vm0, %v2598_v4 }
  0x55   : > { %s2773_s4 = scalar_lea.vmem %s4219_s3, %s2222_s28  ;;  %351 = vst.msk [vmem:[#allocation2 + $0x20] sm:$0xff] (!%p2227_p10), %vm346_vm0, %v2598_v4  ;;  %352 = vst.msk [vmem:[#allocation2 + $0x28] sm:$0xff] (!%p2227_p10), %vm346_vm0, %v2598_v4 }
  0x56   : > { %353 = vst.msk [vmem:[#allocation2 + $0x30] sm:$0xff] (!%p2227_p10), %vm346_vm0, %v2598_v4  ;;  %354 = vst.msk [vmem:[#allocation2 + $0x38] sm:$0xff] (!%p2227_p10), %vm346_vm0, %v2598_v4 }
  0x57   : > { %355 = vst.msk [vmem:[#allocation2 + $0x40] sm:$0xff] (!%p2227_p10), %vm346_vm0, %v2598_v4  ;;  %356 = vst.msk [vmem:[#allocation2 + $0x48] sm:$0xff] (!%p2227_p10), %vm346_vm0, %v2598_v4 }
  0x58   : > { %357 = vst.msk [vmem:[#allocation2 + $0x50] sm:$0xff] (!%p2227_p10), %vm346_vm0, %v2598_v4  ;;  %358 = vst.msk [vmem:[#allocation2 + $0x58] sm:$0xff] (!%p2227_p10), %vm346_vm0, %v2598_v4 }
  0x59   : > { %359 = vst.msk [vmem:[#allocation2 + $0x60] sm:$0xff] (!%p2227_p10), %vm346_vm0, %v2598_v4  ;;  %360 = vst.msk [vmem:[#allocation2 + $0x68] sm:$0xff] (!%p2227_p10), %vm346_vm0, %v2598_v4 }
  0x5a   : > { %361 = vst.msk [vmem:[#allocation2 + $0x70] sm:$0xff] %vm346_vm0, %v2598_v4  ;;  %362 = vst.msk [vmem:[#allocation2 + $0x78] sm:$0xff] %vm346_vm0, %v2598_v4 }
  0x5b   : > { %363 = vst.msk [vmem:[#allocation3] sm:$0xff] %vm346_vm0, %v2598_v4  ;;  %364 = vst.msk [vmem:[#allocation3 + $0x8] sm:$0xff] %vm346_vm0, %v2598_v4 }
  0x5c   : > { %365 = vst.msk [vmem:[#allocation3 + $0x10] sm:$0xff] %vm346_vm0, %v2598_v4  ;;  %366 = vst.msk [vmem:[#allocation3 + $0x18] sm:$0xff] %vm346_vm0, %v2598_v4 }
  0x5d   : > { %367 = vst.msk [vmem:[#allocation3 + $0x20] sm:$0xff] %vm346_vm0, %v2598_v4  ;;  %368 = vst.msk [vmem:[#allocation3 + $0x28] sm:$0xff] %vm346_vm0, %v2598_v4 }
  0x5e   : > { %369 = vst.msk [vmem:[#allocation3 + $0x30] sm:$0xff] %vm346_vm0, %v2598_v4  ;;  %370 = vst.msk [vmem:[#allocation3 + $0x38] sm:$0xff] %vm346_vm0, %v2598_v4 }
  0x5f   : > { %371 = vst.msk [vmem:[#allocation3 + $0x40] sm:$0xff] %vm346_vm0, %v2598_v4  ;;  %372 = vst.msk [vmem:[#allocation3 + $0x48] sm:$0xff] %vm346_vm0, %v2598_v4 }
  0x60   : > { %373 = vst.msk [vmem:[#allocation3 + $0x50] sm:$0xff] %vm346_vm0, %v2598_v4  ;;  %374 = vst.msk [vmem:[#allocation3 + $0x58] sm:$0xff] %vm346_vm0, %v2598_v4 }
  0x61   : > { %375 = vst.msk [vmem:[#allocation3 + $0x60] sm:$0xff] %vm346_vm0, %v2598_v4  ;;  %376 = vst.msk [vmem:[#allocation3 + $0x68] sm:$0xff] %vm346_vm0, %v2598_v4 }
  0x62   : > { %377 = vst.msk [vmem:[#allocation3 + $0x70] sm:$0xff] %vm346_vm0, %v2598_v4  ;;  %378 = vst.msk [vmem:[#allocation3 + $0x78] sm:$0xff] %vm346_vm0, %v2598_v4 }
  0x63 PF: > { %s2810_s29 = sld [smem:[#allocation4 + $0x5]]  ;;  %v386_v5 = vld [vmem:[%s2754_s9 + $0x8] sm:$0xff]  ;;  %v388_v6 = vld [vmem:[%s2754_s9 + $0x18] sm:$0xff]  ;;  %v385_v7 = vld [vmem:[%s2754_s9] sm:$0xff]  ;;  %v2599_v10 = vmov 0.0   ;;  %v2600_v12 = vmov 0  }
  0x64   : > { %v2287_v8 = vpack.c.bf16 %v388_v6, %v386_v5  ;;  %v387_v9 = vld [vmem:[%s2754_s9 + $0x10] sm:$0xff]  ;;  %518 = vmatprep.mubr.f32.mxu0 %v2599_v10  ;;  %743 = vmatprep.mubr.f32.mxu1 %v2599_v10  ;;  %v389_v13 = vld [vmem:[%s2763_s16] sm:$0xff]  ;;  %vm405_vm1 = vcmask 130048   ;;  %v390_v15 = vld [vmem:[%s2763_s16 + $0x8] sm:$0xff]  ;;  %s2957_s9 = sld [smem:[#allocation4 + $0x4]]  ;;  %s2968_s17 = sld [smem:[#allocation4 + $0x3]] }
  0x65   : > { %v2289_v11 = vpack.c.bf16 %v387_v9, %v385_v7  ;;  %2400 = vset.pattern.permute.xlu0 %v2600_v12  ;;  %2401 = vset.pattern.permute.xlu1 %v2600_v12  ;;  %v615_v14 = vld [vmem:[%s2768_s10] sm:$0xff]  ;;  %v616_v16 = vld [vmem:[%s2768_s10 + $0x8] sm:$0xff]  ;;  %v391_v18 = vld [vmem:[%s2763_s16 + $0x10] sm:$0xff]  ;;  %s2970_s28 = sld [smem:[#allocation4 + $0x1]]  ;;  %s3057_s12 = sld [smem:[#allocation4 + $0x2]] }
  0x66   : > { %2288 = vmatprep.subr.bf16.mxu0 %v2287_v8  ;;  %2292 = vmatprep.subr.bf16.mxu1 %v2287_v8  ;;  %v1453_v17 = vld [vmem:[%s2773_s4] sm:$0xff]  ;;  %v617_v19 = vld [vmem:[%s2768_s10 + $0x10] sm:$0xff]  ;;  %v1454_v21 = vld [vmem:[%s2773_s4 + $0x8] sm:$0xff]  ;;  %p2265_p12 = scmp.ne.s32.totalorder %s2579_s23, 1 }
  0x67   : > { %2290 = vmatpush1.bf16.msra.mxu0 %v2289_v11  ;;  %2294 = vmatpush1.bf16.msra.mxu1 %v2289_v11  ;;  %v1455_v20 = vld [vmem:[%s2773_s4 + $0x10] sm:$0xff]  ;;  %v1456_v22 = vld [vmem:[%s2773_s4 + $0x18] sm:$0xff]  ;;  %v1457_v25 = vld [vmem:[%s2773_s4 + $0x20] sm:$0xff] }
  0x68   : > { %1471 = vperm.xlu0 %2400, %v1453_v17   ;;  %1481 = vperm.xlu1 %2401, %v1455_v20   ;;  %v392_v23 = vld [vmem:[%s2763_s16 + $0x18] sm:$0xff]  ;;  %v1458_v26 = vld [vmem:[%s2773_s4 + $0x28] sm:$0xff]  ;;  %v393_v27 = vld [vmem:[%s2763_s16 + $0x20] sm:$0xff] }
  0x69   : > { %v618_v24 = vld [vmem:[%s2768_s10 + $0x18] sm:$0xff]  ;;  %v619_v28 = vld [vmem:[%s2768_s10 + $0x20] sm:$0xff]  ;;  %v1459_v29 = vld [vmem:[%s2773_s4 + $0x30] sm:$0xff] }
  0x6a   : > { %2233 = vmatmul.mubr.msk.f32.vlgmr.msra.gmra.mrb[0].mxu0 %vm405_vm1, %v389_v13  ;;  %2249 = vmatmul.mubr.msk.f32.vlgmr.msra.gmra.mrb[0].mxu1 %vm405_vm1, %v615_v14  ;;  %v1460_v30 = vld [vmem:[%s2773_s4 + $0x38] sm:$0xff]  ;;  %v394_v31 = vld [vmem:[%s2763_s16 + $0x28] sm:$0xff]  ;;  %v1461_v33 = vld [vmem:[%s2773_s4 + $0x40] sm:$0xff] }
  0x6b   : > { %524 = vmatprep.mubr.f32.mxu0 %v2599_v10  ;;  %749 = vmatprep.mubr.f32.mxu1 %v2599_v10  ;;  %v620_v32 = vld [vmem:[%s2768_s10 + $0x28] sm:$0xff]  ;;  %v395_v35 = vld [vmem:[%s2763_s16 + $0x30] sm:$0xff]  ;;  %v1464_v38 = vld [vmem:[%s2773_s4 + $0x58] sm:$0xff] }
  0x6c   : > { %1476 = vperm.xlu0 %2400, %v1454_v21   ;;  %1486 = vperm.xlu1 %2401, %v1456_v22   ;;  %v1462_v34 = vld [vmem:[%s2773_s4 + $0x48] sm:$0xff]  ;;  %v621_v36 = vld [vmem:[%s2768_s10 + $0x30] sm:$0xff]  ;;  %v396_v39 = vld [vmem:[%s2763_s16 + $0x38] sm:$0xff] }
  0x6d   : > { %v1463_v37 = vld [vmem:[%s2773_s4 + $0x50] sm:$0xff]  ;;  %v622_v40 = vld [vmem:[%s2768_s10 + $0x38] sm:$0xff]  ;;  %v1465_v41 = vld [vmem:[%s2773_s4 + $0x60] sm:$0xff] }
  0x6e   : > { %2234 = vmatmul.mubr.msk.f32.gmra.mrb[2].mxu0 %vm405_vm1, %v390_v15  ;;  %2250 = vmatmul.mubr.msk.f32.gmra.mrb[2].mxu1 %vm405_vm1, %v616_v16  ;;  %v1466_v42 = vld [vmem:[%s2773_s4 + $0x68] sm:$0xff]  ;;  %v397_v43 = vld [vmem:[%s2763_s16 + $0x40] sm:$0xff]  ;;  %v1467_v45 = vld [vmem:[%s2773_s4 + $0x70] sm:$0xff] }
  0x6f   : > { %530 = vmatprep.mubr.f32.mxu0 %v2599_v10  ;;  %755 = vmatprep.mubr.f32.mxu1 %v2599_v10  ;;  %v623_v44 = vld [vmem:[%s2768_s10 + $0x40] sm:$0xff]  ;;  %v1468_v46 = vld [vmem:[%s2773_s4 + $0x78] sm:$0xff]  ;;  %v398_v47 = vld [vmem:[%s2763_s16 + $0x48] sm:$0xff]  ;;  %s379_s4 = sld [smem:[#allocation4]] }
  0x70   : > { %1491 = vperm.xlu0 %2400, %v1457_v25   ;;  %1496 = vperm.xlu1 %2401, %v1458_v26   ;;  %v624_v48 = vld [vmem:[%s2768_s10 + $0x48] sm:$0xff]  ;;  %v399_v49 = vld [vmem:[%s2763_s16 + $0x50] sm:$0xff]  ;;  %v400_v51 = vld [vmem:[%s2763_s16 + $0x58] sm:$0xff] }
  0x71   : > { %v625_v50 = vld [vmem:[%s2768_s10 + $0x50] sm:$0xff]  ;;  %v626_v52 = vld [vmem:[%s2768_s10 + $0x58] sm:$0xff]  ;;  %v401_v53 = vld [vmem:[%s2763_s16 + $0x60] sm:$0xff] }
  0x72   : > { %2235 = vmatmul.mubr.msk.f32.gmra.mrb[4].mxu0 %vm405_vm1, %v391_v18  ;;  %2251 = vmatmul.mubr.msk.f32.gmra.mrb[4].mxu1 %vm405_vm1, %v617_v19  ;;  %v627_v54 = vld [vmem:[%s2768_s10 + $0x60] sm:$0xff]  ;;  %v402_v55 = vld [vmem:[%s2763_s16 + $0x68] sm:$0xff]  ;;  %v403_v57 = vld [vmem:[%s2763_s16 + $0x70] sm:$0xff] }
  0x73   : > { %536 = vmatprep.mubr.f32.mxu0 %v2599_v10  ;;  %761 = vmatprep.mubr.f32.mxu1 %v2599_v10  ;;  %v628_v56 = vld [vmem:[%s2768_s10 + $0x68] sm:$0xff]  ;;  %v629_v58 = vld [vmem:[%s2768_s10 + $0x70] sm:$0xff]  ;;  %v404_v59 = vld [vmem:[%s2763_s16 + $0x78] sm:$0xff] }
  0x74   : > { %1501 = vperm.xlu0 %2400, %v1459_v29   ;;  %1506 = vperm.xlu1 %2401, %v1460_v30   ;;  %v630_v60 = vld [vmem:[%s2768_s10 + $0x78] sm:$0xff] }
  0x76   : > { %2236 = vmatmul.mubr.msk.f32.gmra.mrb[6].mxu0 %vm405_vm1, %v392_v23  ;;  %2252 = vmatmul.mubr.msk.f32.gmra.mrb[6].mxu1 %vm405_vm1, %v618_v24 }
  0x77   : > { %542 = vmatprep.mubr.f32.mxu0 %v2599_v10  ;;  %767 = vmatprep.mubr.f32.mxu1 %v2599_v10 }
  0x78   : > { %1511 = vperm.xlu0 %2400, %v1461_v33   ;;  %1516 = vperm.xlu1 %2401, %v1462_v34  }
  0x7a   : > { %2237 = vmatmul.mubr.msk.f32.gmra.mrb[8].mxu0 %vm405_vm1, %v393_v27  ;;  %2253 = vmatmul.mubr.msk.f32.gmra.mrb[8].mxu1 %vm405_vm1, %v619_v28  ;;  %v2974_v28 = vstv %s379_s4 }
  0x7b   : > { %548 = vmatprep.mubr.f32.mxu0 %v2599_v10  ;;  %773 = vmatprep.mubr.f32.mxu1 %v2599_v10 }
  0x7c   : > { %1521 = vperm.xlu0 %2400, %v1463_v37   ;;  %1526 = vperm.xlu1 %2401, %v1464_v38  }
  0x7e   : > { %2238 = vmatmul.mubr.msk.f32.gmra.mrb[10].mxu0 %vm405_vm1, %v394_v31  ;;  %2254 = vmatmul.mubr.msk.f32.gmra.mrb[10].mxu1 %vm405_vm1, %v620_v32 }
  0x7f   : > { %554 = vmatprep.mubr.f32.mxu0 %v2599_v10  ;;  %779 = vmatprep.mubr.f32.mxu1 %v2599_v10 }
  0x80   : > { %1531 = vperm.xlu0 %2400, %v1465_v41   ;;  %1536 = vperm.xlu1 %2401, %v1466_v42  }
  0x82   : > { %2239 = vmatmul.mubr.msk.f32.gmra.mrb[12].mxu0 %vm405_vm1, %v395_v35  ;;  %2255 = vmatmul.mubr.msk.f32.gmra.mrb[12].mxu1 %vm405_vm1, %v621_v36 }
  0x83   : > { %560 = vmatprep.mubr.f32.mxu0 %v2599_v10  ;;  %785 = vmatprep.mubr.f32.mxu1 %v2599_v10 }
  0x84   : > { %1541 = vperm.xlu0 %2400, %v1467_v45   ;;  %1546 = vperm.xlu1 %2401, %v1468_v46  }
  0x86   : > { %2240 = vmatmul.mubr.msk.f32.gmra.mrb[14].mxu0 %vm405_vm1, %v396_v39  ;;  %2256 = vmatmul.mubr.msk.f32.gmra.mrb[14].mxu1 %vm405_vm1, %v622_v40 }
  0x87   : > { %566 = vmatprep.mubr.f32.mxu0 %v2599_v10  ;;  %791 = vmatprep.mubr.f32.mxu1 %v2599_v10 }
  0x8a   : > { %2241 = vmatmul.mubr.msk.f32.gmra.mrb[16].mxu0 %vm405_vm1, %v397_v43  ;;  %2257 = vmatmul.mubr.msk.f32.gmra.mrb[16].mxu1 %vm405_vm1, %v623_v44  ;;  %v2998_v44 = vstv %s2957_s9 }
  0x8b   : > { %572 = vmatprep.mubr.f32.mxu0 %v2599_v10  ;;  %797 = vmatprep.mubr.f32.mxu1 %v2599_v10 }
  0x8e   : > { %2242 = vmatmul.mubr.msk.f32.gmra.mrb[18].mxu0 %vm405_vm1, %v398_v47  ;;  %2258 = vmatmul.mubr.msk.f32.gmra.mrb[18].mxu1 %vm405_vm1, %v624_v48 }
  0x8f   : > { %578 = vmatprep.mubr.f32.mxu0 %v2599_v10  ;;  %803 = vmatprep.mubr.f32.mxu1 %v2599_v10 }
  0x92   : > { %2243 = vmatmul.mubr.msk.f32.gmra.mrb[20].mxu0 %vm405_vm1, %v399_v49  ;;  %2259 = vmatmul.mubr.msk.f32.gmra.mrb[20].mxu1 %vm405_vm1, %v625_v50 }
  0x93   : > { %584 = vmatprep.mubr.f32.mxu0 %v2599_v10  ;;  %809 = vmatprep.mubr.f32.mxu1 %v2599_v10 }
  0x96   : > { %2244 = vmatmul.mubr.msk.f32.gmra.mrb[22].mxu0 %vm405_vm1, %v400_v51  ;;  %2260 = vmatmul.mubr.msk.f32.gmra.mrb[22].mxu1 %vm405_vm1, %v626_v52 }
  0x97   : > { %590 = vmatprep.mubr.f32.mxu0 %v2599_v10  ;;  %815 = vmatprep.mubr.f32.mxu1 %v2599_v10 }
  0x9a   : > { %2245 = vmatmul.mubr.msk.f32.gmra.mrb[24].mxu0 %vm405_vm1, %v401_v53  ;;  %2261 = vmatmul.mubr.msk.f32.gmra.mrb[24].mxu1 %vm405_vm1, %v627_v54 }
  0x9b   : > { %596 = vmatprep.mubr.f32.mxu0 %v2599_v10  ;;  %821 = vmatprep.mubr.f32.mxu1 %v2599_v10 }
  0x9e   : > { %2246 = vmatmul.mubr.msk.f32.gmra.mrb[26].mxu0 %vm405_vm1, %v402_v55  ;;  %2262 = vmatmul.mubr.msk.f32.gmra.mrb[26].mxu1 %vm405_vm1, %v628_v56 }
  0x9f   : > { %602 = vmatprep.mubr.f32.mxu0 %v2599_v10  ;;  %827 = vmatprep.mubr.f32.mxu1 %v2599_v10 }
  0xa2   : > { %2247 = vmatmul.mubr.msk.f32.gmra.mrb[28].mxu0 %vm405_vm1, %v403_v57  ;;  %2263 = vmatmul.mubr.msk.f32.gmra.mrb[28].mxu1 %vm405_vm1, %v629_v58  ;;  %v3013_v58 = vstv %s2968_s17 }
  0xa3   : > { %608 = vmatprep.mubr.f32.mxu0 %v2599_v10  ;;  %833 = vmatprep.mubr.f32.mxu1 %v2599_v10 }
  0xa6   : > { %2248 = vmatmul.mubr.msk.f32.gmra.mrb[30].mxu0 %vm405_vm1, %v404_v59  ;;  %2264 = vmatmul.mubr.msk.f32.gmra.mrb[30].mxu1 %vm405_vm1, %v630_v60  ;;  %v3016_v59 = vstv %s2970_s28 }
 0x13d   : > { %v520_v61 = vpop.f32.mrb[0].mxu0  ;;  %v2928_v62 = vpop.f32.mrb[0].mxu1 }
 0x13e   : > { %v2930_v63 = vmax.f32 %v520_v61, 0.0  ;;  %v522_v0 = vpop.f32.mrb[1].mxu0  ;;  %v2932_v1 = vpop.f32.mrb[1].mxu1 }
 0x13f   : > { %v2934_v2 = vmax.f32 %v522_v0, 0.0 }
 0x140   : > { %v872_v3 = vmax.f32 %v2930_v63, 1e-30 }
 0x141   : > { %v873_v4 = vmax.f32 %v2934_v2, 1e-30  ;;  %v526_v5 = vpop.f32.mrb[2].mxu0  ;;  %v2938_v6 = vpop.f32.mrb[2].mxu1 }
 0x142   : > { %2402 = vrsqrt.f32 %v872_v3  ;;  %v2940_v7 = vmax.f32 %v526_v5, 0.0  ;;  %v528_v8 = vpop.f32.mrb[3].mxu0  ;;  %v2942_v9 = vpop.f32.mrb[3].mxu1 }
 0x143   : > { %2404 = vrsqrt.f32 %v873_v4  ;;  %v2944_v10 = vmax.f32 %v528_v8, 0.0 }
 0x144   : > { %v874_v11 = vmax.f32 %v2940_v7, 1e-30 }
 0x145   : > { %v875_v12 = vmax.f32 %v2944_v10, 1e-30  ;;  %v532_v13 = vpop.f32.mrb[4].mxu0  ;;  %v2948_v14 = vpop.f32.mrb[4].mxu1 }
 0x146   : > { %2406 = vrsqrt.f32 %v874_v11  ;;  %v2950_v15 = vmax.f32 %v532_v13, 0.0  ;;  %v534_v16 = vpop.f32.mrb[5].mxu0  ;;  %v2952_v17 = vpop.f32.mrb[5].mxu1 }
 0x147   : > { %4316 = vst [vmem:[#allocation14_spill] sm:$0xff] %v2952_v17  ;;  %2408 = vrsqrt.f32 %v875_v12  ;;  %v2954_v18 = vmax.f32 %v534_v16, 0.0 }
 0x148   : > { %v876_v19 = vmax.f32 %v2950_v15, 1e-30 }
 0x149   : > { %4317 = vst [vmem:[#allocation15_spill] sm:$0xff] %v2954_v18  ;;  %v877_v20 = vmax.f32 %v2954_v18, 1e-30  ;;  %v538_v21 = vpop.f32.mrb[6].mxu0  ;;  %v2960_v22 = vpop.f32.mrb[6].mxu1 }
 0x14a   : > { %4318 = vst [vmem:[#allocation16_spill] sm:$0xff] %v2960_v22  ;;  %2410 = vrsqrt.f32 %v876_v19  ;;  %v2962_v23 = vmax.f32 %v538_v21, 0.0  ;;  %v540_v24 = vpop.f32.mrb[7].mxu0  ;;  %v2964_v25 = vpop.f32.mrb[7].mxu1 }
 0x14b   : > { %4320 = vst [vmem:[#allocation18_spill] sm:$0xff] %v2964_v25  ;;  %2412 = vrsqrt.f32 %v877_v20  ;;  %v2966_v26 = vmax.f32 %v540_v24, 0.0 }
 0x14c   : > { %4319 = vst [vmem:[#allocation17_spill] sm:$0xff] %v2962_v23  ;;  %v2972_v27 = vpop.eup %2402  ;;  %v878_v29 = vmax.f32 %v2962_v23, 1e-30 }
 0x14d   : > { %4321 = vst [vmem:[#allocation19_spill] sm:$0xff] %v2966_v26  ;;  %v2977_v30 = vpop.eup %2404  ;;  %v936_v31 = vmul.f32 %v2972_v27, %v2930_v63  ;;  %v879_v32 = vmax.f32 %v2966_v26, 1e-30  ;;  %v544_v33 = vpop.f32.mrb[8].mxu0 }
 0x14e   : > { %v2982_v34 = vpop.f32.mrb[8].mxu1  ;;  %v937_v35 = vmul.f32 %v2977_v30, %v2934_v2  ;;  %2414 = vrsqrt.f32 %v878_v29  ;;  %v2986_v36 = vmax.f32 %v544_v33, 0.0  ;;  %v546_v37 = vpop.f32.mrb[9].mxu0 }
 0x14f   : > { %4322 = vst [vmem:[#allocation20_spill] sm:$0xff] %v2982_v34  ;;  %v2988_v38 = vpop.f32.mrb[9].mxu1  ;;  %v969_v39 = vmul.f32 %v2974_v28, %v936_v31  ;;  %2416 = vrsqrt.f32 %v879_v32  ;;  %v2991_v40 = vmax.f32 %v546_v37, 0.0 }
 0x150   : > { %4323 = vst [vmem:[#allocation21_spill] sm:$0xff] %v2986_v36  ;;  %4324 = vst [vmem:[#allocation22_spill] sm:$0xff] %v2988_v38  ;;  %v2993_v41 = vpop.eup %2406  ;;  %v970_v42 = vmul.f32 %v2974_v28, %v937_v35  ;;  %v880_v43 = vmax.f32 %v2986_v36, 1e-30 }
 0x151   : > { %4325 = vst [vmem:[#allocation23_spill] sm:$0xff] %v2991_v40  ;;  %v3000_v45 = vpop.eup %2408  ;;  %v1001_v46 = vsub.f32 1.0, %v969_v39  ;;  %v1065_v47 = vsub.f32 0.5, %v969_v39  ;;  %v938_v48 = vmul.f32 %v2993_v41, %v2940_v7  ;;  %v881_v49 = vmax.f32 %v2991_v40, 1e-30  ;;  %v550_v50 = vpop.f32.mrb[10].mxu0 }
 0x152   : > { %v3005_v51 = vpop.f32.mrb[10].mxu1  ;;  %v1002_v52 = vsub.f32 1.0, %v970_v42  ;;  %v1066_v53 = vsub.f32 0.5, %v970_v42  ;;  %v939_v54 = vmul.f32 %v3000_v45, %v2944_v10  ;;  %2418 = vrsqrt.f32 %v880_v43  ;;  %v552_v55 = vpop.f32.mrb[11].mxu0 }
 0x153   : > { %4326 = vst [vmem:[#allocation24_spill] sm:$0xff] %v3005_v51  ;;  %v3009_v56 = vpop.f32.mrb[11].mxu1  ;;  %v971_v57 = vmul.f32 %v2974_v28, %v938_v48  ;;  %2420 = vrsqrt.f32 %v881_v49  ;;  %v3020_v61 = vmax.f32 %v1001_v46, 0.0  ;;  %v3022_v0 = vmax.f32 %v1065_v47, 0.0 }
 0x154   : > { %4327 = vst [vmem:[#allocation25_spill] sm:$0xff] %v3009_v56  ;;  %v3018_v60 = vpop.eup %2410  ;;  %v972_v3 = vmul.f32 %v2974_v28, %v939_v54  ;;  %v3025_v4 = vmax.f32 %v550_v50, 0.0  ;;  %v3031_v13 = vmax.f32 %v552_v55, 0.0  ;;  %v3035_v20 = vmax.f32 %v1002_v52, 0.0 }
 0x155   : > { %v3027_v5 = vpop.eup %2412  ;;  %v1003_v8 = vsub.f32 1.0, %v971_v57  ;;  %v1067_v11 = vsub.f32 0.5, %v971_v57  ;;  %v940_v12 = vmul.f32 %v3018_v60, %v2950_v15  ;;  %v556_v16 = vpop.f32.mrb[12].mxu0  ;;  %v3037_v21 = vmax.f32 %v1066_v53, 0.0 }
 0x156   : > { %4328 = vst [vmem:[#allocation26_spill] sm:$0xff] %v3025_v4  ;;  %4329 = vst [vmem:[#allocation27_spill] sm:$0xff] %v3031_v13  ;;  %v3033_v19 = vpop.f32.mrb[12].mxu1  ;;  %v941_v24 = vmul.f32 %v3027_v5, %v2954_v18  ;;  %v882_v29 = vmax.f32 %v3025_v4, 1e-30  ;;  %v558_v31 = vpop.f32.mrb[13].mxu0 }
 0x157   : > { %4330 = vst [vmem:[#allocation28_spill] sm:$0xff] %v3033_v19  ;;  %v3042_v32 = vpop.f32.mrb[13].mxu1  ;;  %v1004_v33 = vsub.f32 1.0, %v972_v3  ;;  %v1068_v35 = vsub.f32 0.5, %v972_v3  ;;  %v973_v37 = vmul.f32 %v2974_v28, %v940_v12  ;;  %v883_v39 = vmax.f32 %v3031_v13, 1e-30 }
 0x158   : > { %4331 = vst [vmem:[#allocation29_spill] sm:$0xff] %v3042_v32  ;;  %v3046_v42 = vpop.eup %2414  ;;  %v3048_v43 = vmax.f32 %v1003_v8, 0.0  ;;  %v3050_v46 = vmax.f32 %v1067_v11, 0.0  ;;  %v974_v47 = vmul.f32 %v2974_v28, %v941_v24  ;;  %2422 = vrsqrt.f32 %v882_v29 }
 0x159   : > { %4332 = vst [vmem:[#allocation30_spill] sm:$0xff] %v3046_v42  ;;  %v3053_v48 = vpop.eup %2416  ;;  %v1005_v49 = vsub.f32 1.0, %v973_v37  ;;  %v1069_v50 = vsub.f32 0.5, %v973_v37  ;;  %v942_v52 = vmul.f32 %v3046_v42, %v2962_v23  ;;  %2424 = vrsqrt.f32 %v883_v39  ;;  %v562_v53 = vpop.f32.mrb[14].mxu0 }
 0x15a   : > { %4333 = vst [vmem:[#allocation31_spill] sm:$0xff] %v3053_v48  ;;  %v3059_v54 = vpop.f32.mrb[14].mxu1  ;;  %v1006_v55 = vsub.f32 1.0, %v974_v47  ;;  %v1070_v57 = vsub.f32 0.5, %v974_v47  ;;  %v943_v3 = vmul.f32 %v3053_v48, %v2966_v26  ;;  %v3063_v8 = vmax.f32 %v556_v16, 0.0  ;;  %v564_v11 = vpop.f32.mrb[15].mxu0 }
 0x15b   : > { %4334 = vst [vmem:[#allocation32_spill] sm:$0xff] %v3059_v54  ;;  %v3065_v12 = vpop.f32.mrb[15].mxu1  ;;  %v3067_v24 = vmax.f32 %v1004_v33, 0.0  ;;  %v3069_v29 = vmax.f32 %v1068_v35, 0.0  ;;  %v3071_v37 = vmax.f32 %v1005_v49, 0.0  ;;  %v975_v39 = vmul.f32 %v2974_v28, %v942_v52 }
 0x15c   : > { %4335 = vst [vmem:[#allocation33_spill] sm:$0xff] %v3063_v8  ;;  %4336 = vst [vmem:[#allocation34_spill] sm:$0xff] %v3065_v12  ;;  %v3074_v32 = vpop.eup %2418  ;;  %v3076_v54 = vmax.f32 %v1069_v50, 0.0  ;;  %v3078_v47 = vmax.f32 %v1006_v55, 0.0  ;;  %v976_v16 = vmul.f32 %v2974_v28, %v943_v3  ;;  %v884_v19 = vmax.f32 %v3063_v8, 1e-30 }
 0x15d   : > { %4337 = vst [vmem:[#allocation35_spill] sm:$0xff] %v3074_v32  ;;  %v3082_v56 = vpop.eup %2420  ;;  %v3084_v33 = vmax.f32 %v1070_v57, 0.0  ;;  %v1007_v35 = vsub.f32 1.0, %v975_v39  ;;  %v1071_v12 = vsub.f32 0.5, %v975_v39  ;;  %v944_v49 = vmul.f32 %v3074_v32, %v2986_v36  ;;  %v568_v52 = vpop.f32.mrb[16].mxu0 }
 0x15e   : > { %4338 = vst [vmem:[#allocation36_spill] sm:$0xff] %v3082_v56  ;;  %v3088_v51 = vpop.f32.mrb[16].mxu1  ;;  %v1008_v50 = vsub.f32 1.0, %v976_v16  ;;  %v1072_v26 = vsub.f32 0.5, %v976_v16  ;;  %v945_v55 = vmul.f32 %v3082_v56, %v2991_v40  ;;  %2426 = vrsqrt.f32 %v884_v19  ;;  %v3092_v3 = vpop.f32.mrb[17].mxu0 }
 0x15f   : > { %4339 = vst [vmem:[#allocation37_spill] sm:$0xff] %v3088_v51  ;;  %v3094_v38 = vpop.f32.mrb[17].mxu1  ;;  %v3096_v57 = vmax.f32 %v1007_v35, 0.0  ;;  %v3098_v23 = vmax.f32 %v1071_v12, 0.0  ;;  %v977_v39 = vmul.f32 %v2974_v28, %v944_v49  ;;  %v3101_v36 = vmax.f32 %v558_v31, 0.0 }
 0x160   : > { %4340 = vst [vmem:[#allocation38_spill] sm:$0xff] %v3094_v38  ;;  %v3103_v51 = vmax.f32 %v1008_v50, 0.0  ;;  %v3105_v16 = vmax.f32 %v1072_v26, 0.0  ;;  %v978_v40 = vmul.f32 %v2974_v28, %v945_v55  ;;  %v3108_v19 = vmax.f32 %v562_v53, 0.0 }
 0x161   : > { %4341 = vst [vmem:[#allocation39_spill] sm:$0xff] %v3096_v57  ;;  %4342 = vst [vmem:[#allocation40_spill] sm:$0xff] %v3098_v23  ;;  %v1009_v56 = vsub.f32 1.0, %v977_v39  ;;  %v1073_v34 = vsub.f32 0.5, %v977_v39  ;;  %v885_v35 = vmax.f32 %v3101_v36, 1e-30  ;;  %v3119_v26 = vstv %s3057_s12 }
 0x162   : > { %4343 = vst [vmem:[#allocation41_spill] sm:$0xff] %v3101_v36  ;;  %4344 = vst [vmem:[#allocation42_spill] sm:$0xff] %v3103_v51  ;;  %v3111_v38 = vmax.f32 %v564_v11, 0.0  ;;  %v3113_v12 = vpop.f32.mrb[18].mxu0  ;;  %v3115_v32 = vpop.eup %2422  ;;  %v1010_v31 = vsub.f32 1.0, %v978_v40  ;;  %v1074_v49 = vsub.f32 0.5, %v978_v40 }
 0x163   : > { %4345 = vst [vmem:[#allocation43_spill] sm:$0xff] %v3105_v16  ;;  %4346 = vst [vmem:[#allocation44_spill] sm:$0xff] %v3108_v19  ;;  %v886_v50 = vmax.f32 %v3108_v19, 1e-30  ;;  %v3121_v25 = vpop.f32.mrb[19].mxu0  ;;  %v3123_v53 = vpop.f32.mrb[18].mxu1  ;;  %v946_v48 = vmul.f32 %v3115_v32, %v3025_v4  ;;  %2428 = vrsqrt.f32 %v885_v35  ;;  %v3149_v35 = vmul.f32 %v3022_v0, %v3022_v0 }
 0x164   : > { %4347 = vst [vmem:[#allocation45_spill] sm:$0xff] %v3111_v38  ;;  %4348 = vst [vmem:[#allocation46_spill] sm:$0xff] %v3115_v32  ;;  %v3125_v55 = vpop.eup %2424  ;;  %v3127_v39 = vmax.f32 %v1009_v56, 0.0  ;;  %v3129_v11 = vmax.f32 %v1073_v34, 0.0  ;;  %v3133_v22 = vpop.f32.mrb[19].mxu1  ;;  %v3135_v40 = vmax.f32 %v1010_v31, 0.0  ;;  %v3145_v34 = vmul.f32 %v3020_v61, %v3020_v61 }
 0x165   : > { %4349 = vst [vmem:[#allocation47_spill] sm:$0xff] %v3123_v53  ;;  %4350 = vst [vmem:[#allocation48_spill] sm:$0xff] %v3125_v55  ;;  %v3137_v42 = vmax.f32 %v1074_v49, 0.0  ;;  %v947_v16 = vmul.f32 %v3125_v55, %v3031_v13  ;;  %2430 = vrsqrt.f32 %v886_v50  ;;  %v979_v53 = vmul.f32 %v2974_v28, %v946_v48  ;;  %v3151_v31 = vpop.f32.mrb[20].mxu0  ;;  %v3153_v49 = vpop.f32.mrb[20].mxu1 }
 0x166   : > { %4351 = vst [vmem:[#allocation49_spill] sm:$0xff] %v3127_v39  ;;  %4352 = vst [vmem:[#allocation50_spill] sm:$0xff] %v3129_v11  ;;  %v887_v56 = vmax.f32 %v3111_v38, 1e-30  ;;  %v3158_v50 = vmul.f32 %v3035_v20, %v3035_v20  ;;  %v3162_v48 = vmul.f32 %v3037_v21, %v3037_v21  ;;  %v3164_v13 = vmax.f32 %v568_v52, 0.0  ;;  %v3166_v4 = vpop.f32.mrb[21].mxu0 }
 0x167   : > { %4353 = vst [vmem:[#allocation51_spill] sm:$0xff] %v3133_v22  ;;  %4354 = vst [vmem:[#allocation52_spill] sm:$0xff] %v3135_v40  ;;  %v980_v22 = vmul.f32 %v2974_v28, %v947_v16  ;;  %v3168_v55 = vpop.f32.mrb[21].mxu1  ;;  %v1011_v32 = vsub.f32 1.0, %v979_v53  ;;  %v1356_v16 = vmul.f32 %v2998_v44, %v3149_v35  ;;  %v1389_v39 = vmul.f32 %v3013_v58, %v3145_v34 }
 0x168   : > { %4355 = vst [vmem:[#allocation53_spill] sm:$0xff] %v3137_v42  ;;  %4356 = vst [vmem:[#allocation54_spill] sm:$0xff] %v3153_v49  ;;  %v1075_v42 = vsub.f32 0.5, %v979_v53  ;;  %2432 = vrsqrt.f32 %v887_v56  ;;  %v3172_v49 = vpop.eup %2426  ;;  %v1357_v52 = vmul.f32 %v2998_v44, %v3162_v48  ;;  %v1390_v56 = vmul.f32 %v3013_v58, %v3158_v50 }
 0x169   : > { %4357 = vst [vmem:[#allocation55_spill] sm:$0xff] %v3164_v13  ;;  %4358 = vst [vmem:[#allocation56_spill] sm:$0xff] %v3168_v55  ;;  %v1012_v40 = vsub.f32 1.0, %v980_v22  ;;  %v1076_v11 = vsub.f32 0.5, %v980_v22  ;;  %v3178_v51 = vmax.f32 %v1011_v32, 0.0  ;;  %v948_v53 = vmul.f32 %v3172_v49, %v3063_v8  ;;  %v3186_v55 = vpop.f32.mrb[22].mxu0 }
 0x16a   : > { %4359 = vst [vmem:[#allocation57_spill] sm:$0xff] %v3172_v49  ;;  %v3180_v23 = vmax.f32 %v1075_v42, 0.0  ;;  %4362 = vst [vmem:[#allocation60_spill] sm:$0xff] %v3186_v55  ;;  %v3188_v57 = vpop.f32.mrb[22].mxu1  ;;  %v1421_v18 = vsub.f32 %v1356_v16, %v1389_v39  ;;  %v888_v32 = vmax.f32 %v3164_v13, 1e-30  ;;  %v1422_v49 = vsub.f32 %v1357_v52, %v1390_v56 }
 0x16b   : > { %4360 = vst [vmem:[#allocation58_spill] sm:$0xff] %v3178_v51  ;;  %4363 = vst [vmem:[#allocation61_spill] sm:$0xff] %v3188_v57  ;;  %v3190_v22 = vmax.f32 %v1012_v40, 0.0  ;;  %v3192_v17 = vmax.f32 %v1076_v11, 0.0  ;;  %v3195_v51 = vpop.f32.mrb[23].mxu0  ;;  %v3197_v42 = vpop.f32.mrb[23].mxu1  ;;  %v981_v8 = vmul.f32 %v2974_v28, %v948_v53  ;;  %v3205_v57 = vmul.f32 %v3048_v43, %v3048_v43 }
 0x16c   : > { %4361 = vst [vmem:[#allocation59_spill] sm:$0xff] %v3180_v23  ;;  %4366 = vst [vmem:[#allocation64_spill] sm:$0xff] %v3195_v51  ;;  %v3201_v23 = vmax.f32 %v3092_v3, 0.0  ;;  %v3207_v40 = vpop.permute.xlu0 %1471  ;;  %v1581_v39 = vmul.f32 %v2972_v27, %v1421_v18  ;;  %2434 = vrsqrt.f32 %v888_v32  ;;  %v3212_v11 = vmul.f32 %v3050_v46, %v3050_v46 }
 0x16d   : > { %4364 = vst [vmem:[#allocation62_spill] sm:$0xff] %v3190_v22  ;;  %4365 = vst [vmem:[#allocation63_spill] sm:$0xff] %v3192_v17  ;;  %v3216_v16 = vmul.f32 %v3067_v24, %v3067_v24  ;;  %v3218_v52 = vpop.eup %2428  ;;  %v1013_v3 = vsub.f32 1.0, %v981_v8  ;;  %v1077_v53 = vsub.f32 0.5, %v981_v8  ;;  %v1582_v56 = vmul.f32 %v2977_v30, %v1422_v49  ;;  %v3222_v17 = vpop.f32.mrb[24].mxu0 }
 0x16e   : > { %4367 = vst [vmem:[#allocation65_spill] sm:$0xff] %v3197_v42  ;;  %4368 = vst [vmem:[#allocation66_spill] sm:$0xff] %v3201_v23  ;;  %v889_v42 = vmax.f32 %v3201_v23, 1e-30  ;;  %v3224_v18 = vpop.f32.mrb[24].mxu1  ;;  %v949_v32 = vmul.f32 %v3218_v52, %v3101_v36  ;;  %v3231_v22 = vmul.f32 %v1581_v39, %v2928_v62  ;;  %v1358_v51 = vmul.f32 %v2998_v44, %v3212_v11  ;;  %v3237_v8 = vpop.f32.mrb[25].mxu0 }
 0x16f   : > { %4369 = vst [vmem:[#allocation67_spill] sm:$0xff] %v3218_v52  ;;  %4370 = vst [vmem:[#allocation68_spill] sm:$0xff] %v3222_v17  ;;  %v3226_v27 = vpop.eup %2430  ;;  %v1391_v30 = vmul.f32 %v3013_v58, %v3205_v57  ;;  %v3239_v49 = vpop.f32.mrb[25].mxu1  ;;  %v3241_v17 = vmax.f32 %v1013_v3, 0.0  ;;  %v1614_v62 = vmul.f32 %v1582_v56, %v2932_v1  ;;  %v3251_v55 = vmul.f32 %v3069_v29, %v3069_v29 }
 0x170   : > { %4371 = vst [vmem:[#allocation69_spill] sm:$0xff] %v3224_v18  ;;  %4372 = vst [vmem:[#allocation70_spill] sm:$0xff] %v3226_v27  ;;  %v3243_v18 = vmax.f32 %v1077_v53, 0.0  ;;  %v950_v36 = vmul.f32 %v3226_v27, %v3108_v19  ;;  %v982_v39 = vmul.f32 %v2974_v28, %v949_v32  ;;  %2436 = vrsqrt.f32 %v889_v42 }
 0x171   : > { %4373 = vst [vmem:[#allocation71_spill] sm:$0xff] %v3237_v8  ;;  %4374 = vst [vmem:[#allocation72_spill] sm:$0xff] %v3239_v49  ;;  %v1423_v52 = vsub.f32 %v1358_v51, %v1391_v30  ;;  %vm1549_vm2 = vcmp.gt.f32.partialorder %v2930_v63, %v3207_v40  ;;  %vm1550_vm3 = vcmp.gt.f32.partialorder %v2934_v2, %v3207_v40  ;;  %v3266_v53 = vpop.f32.mrb[26].mxu0  ;;  %v3268_v56 = vpop.f32.mrb[26].mxu1 }
 0x172   : > { %4375 = vst [vmem:[#allocation73_spill] sm:$0xff] %v3241_v17  ;;  %4376 = vst [vmem:[#allocation74_spill] sm:$0xff] %v3243_v18  ;;  %v3253_v8 = vpop.eup %2432  ;;  %v983_v3 = vmul.f32 %v2974_v28, %v950_v36  ;;  %v1392_v1 = vmul.f32 %v3013_v58, %v3216_v16  ;;  %v1193_v51 = vmul.f32 %v3145_v34, %v3020_v61  ;;  %v1014_v32 = vsub.f32 1.0, %v982_v39  ;;  %v3273_v19 = vpop.f32.mrb[27].mxu0 }
 0x173   : > { %4377 = vst [vmem:[#allocation75_spill] sm:$0xff] %v3253_v8  ;;  %v1194_v42 = vmul.f32 %v3158_v50, %v3035_v20  ;;  %4378 = vst [vmem:[#allocation76_spill] sm:$0xff] %v3268_v56  ;;  %v1078_v30 = vsub.f32 0.5, %v982_v39  ;;  %v951_v49 = vmul.f32 %v3253_v8, %v3111_v38  ;;  %v1583_v36 = vmul.f32 %v2993_v41, %v1423_v52  ;;  %v3293_v17 = vpop.f32.mrb[27].mxu1 }
 0x174   : > { %v1015_v27 = vsub.f32 1.0, %v983_v3  ;;  %v1079_v18 = vsub.f32 0.5, %v983_v3  ;;  %v1359_v61 = vmul.f32 %v2998_v44, %v3251_v55  ;;  %v1226_v20 = vmul.f32 %v3016_v59, %v1193_v51  ;;  %4379 = vst [vmem:[#allocation77_spill] sm:$0xff] %v3293_v17 }
 0x175   : > { %v3278_v34 = vmax.f32 %v1014_v32, 0.0  ;;  %v3280_v50 = vmax.f32 %v1078_v30, 0.0  ;;  %v984_v39 = vmul.f32 %v2974_v28, %v951_v49  ;;  %v3284_v56 = vmul.f32 %v1583_v36, %v2938_v6  ;;  %v3291_v8 = vpop.f32.mrb[28].mxu0 }
 0x176   : > { %v3286_v38 = vmax.f32 %v1015_v27, 0.0  ;;  %v3288_v41 = vmax.f32 %v1079_v18, 0.0  ;;  %v1424_v52 = vsub.f32 %v1359_v61, %v1392_v1  ;;  %v1227_v3 = vmul.f32 %v3016_v59, %v1194_v42  ;;  %v3295_v51 = vpop.eup %2434  ;;  %v3301_v27 = vpop.f32.mrb[29].mxu0 }
 0x177   : > { %4380 = vst [vmem:[#allocation78_spill] sm:$0xff] %v3295_v51  ;;  %v1016_v32 = vsub.f32 1.0, %v984_v39  ;;  %v1080_v30 = vsub.f32 0.5, %v984_v39  ;;  %v1258_v49 = vmul.f32 %v3149_v35, %v3022_v0  ;;  %v1259_v6 = vmul.f32 %v3162_v48, %v3037_v21  ;;  %v3303_v18 = vpop.f32.mrb[28].mxu1  ;;  %v3314_v39 = vpop.permute.xlu0 %1476 }
 0x178   : > { %4381 = vst [vmem:[#allocation79_spill] sm:$0xff] %v3303_v18  ;;  %v952_v1 = vmul.f32 %v3295_v51, %v3164_v13  ;;  %v1584_v42 = vmul.f32 %v3000_v45, %v1424_v52  ;;  %v3309_v36 = vmax.f32 %v3113_v12, 0.0  ;;  %v3312_v61 = vmax.f32 %v3121_v25, 0.0 }
 0x179   : > { %v3316_v0 = vmax.f32 %v1016_v32, 0.0  ;;  %v3318_v21 = vmax.f32 %v1080_v30, 0.0  ;;  %v1291_v35 = vmul.f32 %v3119_v26, %v1258_v49  ;;  %v1292_v48 = vmul.f32 %v3119_v26, %v1259_v6  ;;  %v3326_v25 = vpop.f32.mrb[30].mxu0  ;;  %v3339_v6 = vpop.f32.mrb[29].mxu1 }
 0x17a   : > { %4382 = vst [vmem:[#allocation80_spill] sm:$0xff] %v3309_v36  ;;  %4383 = vst [vmem:[#allocation81_spill] sm:$0xff] %v3312_v61  ;;  %v985_v18 = vmul.f32 %v2974_v28, %v952_v1  ;;  %v1616_v45 = vmul.f32 %v1584_v42, %v2942_v9  ;;  %v890_v12 = vmax.f32 %v3309_v36, 1e-30  ;;  %v891_v52 = vmax.f32 %v3312_v61, 1e-30  ;;  %v3328_v17 = vpop.eup %2436 }
 0x17b   : > { %4384 = vst [vmem:[#allocation82_spill] sm:$0xff] %v3328_v17  ;;  %v1323_v32 = vsub.f32 %v1226_v20, %v1291_v35  ;;  %v1324_v13 = vsub.f32 %v1227_v3, %v1292_v48  ;;  %v1645_v30 = vsel %vm1549_vm2, %v3231_v22, 0.0  ;;  %v1646_v49 = vsel %vm1550_vm3, %v1614_v62, 0.0  ;;  %v3337_v9 = vpop.f32.mrb[31].mxu0  ;;  %4385 = vst [vmem:[#allocation83_spill] sm:$0xff] %v3339_v6 }
 0x17c   : > { %vm1551_vm4 = vcmp.gt.f32.partialorder %v2940_v7, %v3314_v39  ;;  %vm1552_vm5 = vcmp.gt.f32.partialorder %v2944_v10, %v3314_v39  ;;  %v1017_v20 = vsub.f32 1.0, %v985_v18  ;;  %v1081_v3 = vsub.f32 0.5, %v985_v18 }
 0x17d   : > { %v953_v63 = vmul.f32 %v3328_v17, %v3201_v23  ;;  %2438 = vrsqrt.f32 %v890_v12  ;;  %v1693_v22 = vadd.f32 %v1324_v13, %v1323_v32  ;;  %v1790_v2 = vadd.f32 %v1646_v49, %v1645_v30 }
 0x17e   : > { %2440 = vrsqrt.f32 %v891_v52  ;;  %v3349_v40 = vmul.f32 %v3071_v37, %v3071_v37  ;;  %v3351_v62 = vmax.f32 %v1017_v20, 0.0  ;;  %v3353_v1 = vmax.f32 %v1081_v3, 0.0  ;;  %v3373_v52 = vpop.f32.mrb[30].mxu1 }
 0x17f   : > { %v986_v42 = vmul.f32 %v2974_v28, %v953_v63  ;;  %v3358_v18 = vmul.f32 %v3076_v54, %v3076_v54  ;;  %1694 = vadd.xlane.f32.xlu0 %v1693_v22  ;;  %1791 = vadd.xlane.f32.xlu1 %v1790_v2  ;;  %v3363_v35 = vmax.f32 %v3151_v31, 0.0  ;;  %v3367_v48 = vmul.f32 %v3078_v47, %v3078_v47 }
 0x180   : > { %4386 = vst [vmem:[#allocation84_spill] sm:$0xff] %v3353_v1  ;;  %v1393_v13 = vmul.f32 %v3013_v58, %v3349_v40  ;;  %v3371_v12 = vmul.f32 %v3084_v33, %v3084_v33  ;;  %4388 = vst [vmem:[#allocation86_spill] sm:$0xff] %v3373_v52  ;;  %v3378_v20 = vmax.f32 %v3166_v4, 0.0  ;;  %v1195_v22 = vmul.f32 %v3205_v57, %v3048_v43  ;;  %v3392_v4 = vpop.permute.xlu1 %1481 }
 0x181   : > { %4387 = vst [vmem:[#allocation85_spill] sm:$0xff] %v3363_v35  ;;  %v1018_v32 = vsub.f32 1.0, %v986_v42  ;;  %v1082_v30 = vsub.f32 0.5, %v986_v42  ;;  %v1360_v49 = vmul.f32 %v2998_v44, %v3358_v18  ;;  %v892_v31 = vmax.f32 %v3363_v35, 1e-30 }
 0x182   : > { %4389 = vst [vmem:[#allocation87_spill] sm:$0xff] %v3378_v20  ;;  %v1361_v3 = vmul.f32 %v2998_v44, %v3371_v12  ;;  %v1394_v63 = vmul.f32 %v3013_v58, %v3367_v48  ;;  %v893_v6 = vmax.f32 %v3378_v20, 1e-30  ;;  %v1196_v17 = vmul.f32 %v3216_v16, %v3067_v24  ;;  %v3411_v16 = vpop.f32.mrb[31].mxu1 }
 0x183   : > { %v3387_v2 = vmax.f32 %v1018_v32, 0.0  ;;  %v3389_v42 = vmax.f32 %v1082_v30, 0.0  ;;  %v1425_v52 = vsub.f32 %v1360_v49, %v1393_v13  ;;  %2442 = vrsqrt.f32 %v892_v31  ;;  %4390 = vst [vmem:[#allocation88_spill] sm:$0xff] %v3411_v16  ;;  %v4397_v49 = vld [vmem:[#allocation60_spill] sm:$0xff] }
 0x184   : > { %v1426_v23 = vsub.f32 %v1361_v3, %v1394_v63  ;;  %v1228_v51 = vmul.f32 %v3016_v59, %v1195_v22  ;;  %2444 = vrsqrt.f32 %v893_v6  ;;  %v1260_v43 = vmul.f32 %v3212_v11, %v3050_v46 }
 0x185   : > { %v1585_v1 = vmul.f32 %v3018_v60, %v1425_v52  ;;  %v1261_v57 = vmul.f32 %v3251_v55, %v3069_v29  ;;  %v1229_v32 = vmul.f32 %v3016_v59, %v1196_v17  ;;  %v1647_v24 = vsel %vm1551_vm4, %v3284_v56, 0.0  ;;  %v4393_v29 = vld [vmem:[#allocation15_spill] sm:$0xff]  ;;  %v4394_v55 = vld [vmem:[#allocation14_spill] sm:$0xff] }
 0x186   : > { %v1586_v13 = vmul.f32 %v3027_v5, %v1426_v23  ;;  %v1648_v60 = vsel %vm1552_vm5, %v1616_v45, 0.0  ;;  %vm1553_vm6 = vcmp.gt.f32.partialorder %v2950_v15, %v3392_v4  ;;  %v1293_v17 = vmul.f32 %v3119_v26, %v1260_v43  ;;  %v4395_v56 = vld [vmem:[#allocation39_spill] sm:$0xff]  ;;  %v4399_v43 = vld [vmem:[#allocation42_spill] sm:$0xff] }
 0x187   : > { %v3413_v6 = vpop.eup %2438  ;;  %v1617_v23 = vmul.f32 %v1585_v1, %v2948_v14  ;;  %v1294_v5 = vmul.f32 %v3119_v26, %v1261_v57  ;;  %v1793_v46 = vadd.f32 %v1648_v60, %v1647_v24  ;;  %vm1554_vm7 = vcmp.gt.f32.partialorder %v4393_v29, %v3392_v4  ;;  %v4396_v14 = vld [vmem:[#allocation40_spill] sm:$0xff]  ;;  %v4400_v24 = vld [vmem:[#allocation43_spill] sm:$0xff] }
 0x188   : > { %4391 = vst [vmem:[#allocation89_spill] sm:$0xff] %v3413_v6  ;;  %v3420_v7 = vpop.eup %2440  ;;  %v954_v10 = vmul.f32 %v3413_v6, %v3309_v36  ;;  %v1618_v11 = vmul.f32 %v1586_v13, %v4394_v55  ;;  %v3429_v39 = vmul.f32 %v4395_v56, %v4395_v56  ;;  %v3433_v45 = vmul.f32 %v4396_v14, %v4396_v14 }
 0x189   : > { %4392 = vst [vmem:[#allocation90_spill] sm:$0xff] %v3420_v7  ;;  %v955_v1 = vmul.f32 %v3420_v7, %v3312_v61  ;;  %v1325_v52 = vsub.f32 %v1228_v51, %v1293_v17  ;;  %v1326_v30 = vsub.f32 %v1229_v32, %v1294_v5  ;;  %1794 = vadd.xlane.f32.xlu0 %v1793_v46  ;;  %v3438_v31 = vmax.f32 %v4397_v49, 0.0  ;;  %v4402_v61 = vld [vmem:[#allocation30_spill] sm:$0xff] }
 0x18a   : > { %v987_v3 = vmul.f32 %v2974_v28, %v954_v10  ;;  %v1362_v63 = vmul.f32 %v2998_v44, %v3433_v45  ;;  %v1395_v22 = vmul.f32 %v3013_v58, %v3429_v39  ;;  %v3447_v57 = vmul.f32 %v4399_v43, %v4399_v43 }
 0x18b   : > { %4398 = vst [vmem:[#allocation15_spill] sm:$0xff] %v3438_v31  ;;  %v988_v13 = vmul.f32 %v2974_v28, %v955_v1  ;;  %v1696_v51 = vadd.f32 %v1326_v30, %v1325_v52  ;;  %v894_v32 = vmax.f32 %v3438_v31, 1e-30  ;;  %v3453_v60 = vmul.f32 %v4400_v24, %v4400_v24 }
 0x18c   : > { %v1019_v17 = vsub.f32 1.0, %v987_v3  ;;  %v1083_v5 = vsub.f32 0.5, %v987_v3  ;;  %v1427_v46 = vsub.f32 %v1362_v63, %v1395_v22  ;;  %v1396_v10 = vmul.f32 %v3013_v58, %v3447_v57  ;;  %v4403_v3 = vld [vmem:[#allocation64_spill] sm:$0xff] }
 0x18d   : > { %v1020_v55 = vsub.f32 1.0, %v988_v13  ;;  %v1084_v49 = vsub.f32 0.5, %v988_v13  ;;  %1697 = vadd.xlane.f32.xlu1 %v1696_v51  ;;  %2446 = vrsqrt.f32 %v894_v32  ;;  %v1363_v1 = vmul.f32 %v2998_v44, %v3453_v60  ;;  %v3459_v52 = vpop.eup %2442 }
 0x18e   : > { %4401 = vst [vmem:[#allocation14_spill] sm:$0xff] %v3459_v52  ;;  %v3461_v30 = vmax.f32 %v1019_v17, 0.0  ;;  %v3463_v16 = vmax.f32 %v1083_v5, 0.0  ;;  %v1587_v36 = vmul.f32 %v4402_v61, %v1427_v46  ;;  %v3467_v63 = vmax.f32 %v4403_v3, 0.0  ;;  %v3469_v22 = vpop.eup %2444  ;;  %v4407_v5 = vld [vmem:[#allocation16_spill] sm:$0xff] }
 0x18f   : > { %4405 = vst [vmem:[#allocation40_spill] sm:$0xff] %v3469_v22  ;;  %v3471_v7 = vmax.f32 %v1020_v55, 0.0  ;;  %v3473_v13 = vmax.f32 %v1084_v49, 0.0  ;;  %v956_v51 = vmul.f32 %v3459_v52, %v3363_v35  ;;  %v1428_v32 = vsub.f32 %v1363_v1, %v1396_v10  ;;  %v4408_v49 = vld [vmem:[#allocation31_spill] sm:$0xff]  ;;  %v4409_v35 = vld [vmem:[#allocation18_spill] sm:$0xff] }
 0x190   : > { %4404 = vst [vmem:[#allocation39_spill] sm:$0xff] %v3467_v63  ;;  %v957_v17 = vmul.f32 %v3469_v22, %v3378_v20  ;;  %v3480_v6 = vmul.f32 %v1587_v36, %v4407_v5  ;;  %v895_v61 = vmax.f32 %v3467_v63, 1e-30  ;;  %v1649_v46 = vsel %vm1553_vm6, %v1617_v23, 0.0  ;;  %v4421_v22 = vld [vmem:[#allocation71_spill] sm:$0xff] }
 0x191   : > { %4406 = vst [vmem:[#allocation60_spill] sm:$0xff] %v3473_v13  ;;  %v989_v55 = vmul.f32 %v2974_v28, %v956_v51  ;;  %v1588_v3 = vmul.f32 %v4408_v49, %v1428_v32  ;;  %v1650_v10 = vsel %vm1554_vm7, %v1618_v11, 0.0  ;;  %v1197_v1 = vmul.f32 %v3349_v40, %v3071_v37  ;;  %v4444_v13 = vld [vmem:[#allocation48_spill] sm:$0xff] }
 0x192   : > { %v990_v36 = vmul.f32 %v2974_v28, %v957_v17  ;;  %2448 = vrsqrt.f32 %v895_v61  ;;  %v1796_v5 = vadd.f32 %v1650_v10, %v1649_v46  ;;  %v1198_v20 = vmul.f32 %v3367_v48, %v3078_v47  ;;  %v4412_v48 = vld [vmem:[#allocation49_spill] sm:$0xff]  ;;  %v4417_v10 = vld [vmem:[#allocation68_spill] sm:$0xff] }
 0x193   : > { %v1021_v15 = vsub.f32 1.0, %v989_v55  ;;  %v1085_v23 = vsub.f32 0.5, %v989_v55  ;;  %v3497_v51 = vmul.f32 %v1588_v3, %v4409_v35  ;;  %v1230_v32 = vmul.f32 %v3016_v59, %v1197_v1 }
 0x194   : > { %v1022_v49 = vsub.f32 1.0, %v990_v36  ;;  %v1086_v4 = vsub.f32 0.5, %v990_v36  ;;  %1797 = vadd.xlane.f32.xlu1 %v1796_v5  ;;  %v1231_v29 = vmul.f32 %v3016_v59, %v1198_v20  ;;  %v1262_v37 = vmul.f32 %v3358_v18, %v3076_v54  ;;  %v4415_v20 = vld [vmem:[#allocation50_spill] sm:$0xff] }
 0x195   : > { %v3503_v40 = vmax.f32 %v1021_v15, 0.0  ;;  %v3505_v11 = vmax.f32 %v1085_v23, 0.0  ;;  %v1263_v47 = vmul.f32 %v3371_v12, %v3084_v33  ;;  %v1137_v35 = vmul.f32 %v4412_v48, %v4412_v48  ;;  %v4419_v12 = vld [vmem:[#allocation52_spill] sm:$0xff]  ;;  %v4420_v23 = vld [vmem:[#allocation53_spill] sm:$0xff] }
 0x196   : > { %v3511_v17 = vmax.f32 %v1022_v49, 0.0  ;;  %v3513_v61 = vmax.f32 %v1086_v4, 0.0  ;;  %v1295_v46 = vmul.f32 %v3119_v26, %v1262_v37  ;;  %v1169_v55 = vmul.f32 %v4415_v20, %v4415_v20 }
 0x197   : > { %4410 = vst [vmem:[#allocation42_spill] sm:$0xff] %v3503_v40  ;;  %4411 = vst [vmem:[#allocation43_spill] sm:$0xff] %v3505_v11  ;;  %v3518_v54 = vpop.eup %2446  ;;  %v1296_v18 = vmul.f32 %v3119_v26, %v1263_v47  ;;  %v1397_v3 = vmul.f32 %v3013_v58, %v1137_v35  ;;  %v3523_v33 = vmax.f32 %v4417_v10, 0.0  ;;  %v1138_v1 = vmul.f32 %v4419_v12, %v4419_v12  ;;  %v4424_v11 = vld [vmem:[#allocation35_spill] sm:$0xff] }
 0x198   : > { %4413 = vst [vmem:[#allocation30_spill] sm:$0xff] %v3511_v17  ;;  %4414 = vst [vmem:[#allocation64_spill] sm:$0xff] %v3513_v61  ;;  %v958_v36 = vmul.f32 %v3518_v54, %v3438_v31  ;;  %v1327_v5 = vsub.f32 %v1230_v32, %v1295_v46  ;;  %v1364_v15 = vmul.f32 %v2998_v44, %v1169_v55  ;;  %v3535_v10 = vmax.f32 %v4421_v22, 0.0 }
 0x199   : > { %4416 = vst [vmem:[#allocation16_spill] sm:$0xff] %v3518_v54  ;;  %4418 = vst [vmem:[#allocation31_spill] sm:$0xff] %v3523_v33  ;;  %v1170_v49 = vmul.f32 %v4420_v23, %v4420_v23  ;;  %v1328_v4 = vsub.f32 %v1231_v29, %v1296_v18  ;;  %v896_v37 = vmax.f32 %v3523_v33, 1e-30  ;;  %v1398_v47 = vmul.f32 %v3013_v58, %v1138_v1 }
 0x19a   : > { %4422 = vst [vmem:[#allocation18_spill] sm:$0xff] %v3535_v10  ;;  %v991_v52 = vmul.f32 %v2974_v28, %v958_v36  ;;  %v1429_v61 = vsub.f32 %v1364_v15, %v1397_v3  ;;  %v1199_v32 = vmul.f32 %v3429_v39, %v4395_v56  ;;  %v897_v31 = vmax.f32 %v3535_v10, 1e-30  ;;  %v3547_v3 = vpop.permute.xlu1 %1486 }
 0x19b   : > { %v1365_v17 = vmul.f32 %v2998_v44, %v1170_v49  ;;  %v1699_v46 = vadd.f32 %v1328_v4, %v1327_v5  ;;  %2450 = vrsqrt.f32 %v896_v37  ;;  %v1200_v29 = vmul.f32 %v3447_v57, %v4399_v43  ;;  %v4427_v57 = vld [vmem:[#allocation20_spill] sm:$0xff]  ;;  %v4429_v37 = vld [vmem:[#allocation58_spill] sm:$0xff] }
 0x19c   : > { %v3544_v18 = vpop.eup %2448  ;;  %v1023_v54 = vsub.f32 1.0, %v991_v52  ;;  %v1087_v22 = vsub.f32 0.5, %v991_v52  ;;  %v1589_v40 = vmul.f32 %v4424_v11, %v1429_v61  ;;  %2452 = vrsqrt.f32 %v897_v31  ;;  %v4428_v11 = vld [vmem:[#allocation36_spill] sm:$0xff] }
 0x19d   : > { %4423 = vst [vmem:[#allocation49_spill] sm:$0xff] %v3544_v18  ;;  %v1430_v36 = vsub.f32 %v1365_v17, %v1398_v47  ;;  %v959_v15 = vmul.f32 %v3544_v18, %v3467_v63  ;;  %1700 = vadd.xlane.f32.xlu0 %v1699_v46  ;;  %v1232_v56 = vmul.f32 %v3016_v59, %v1199_v32  ;;  %v4431_v32 = vld [vmem:[#allocation22_spill] sm:$0xff]  ;;  %v4432_v46 = vld [vmem:[#allocation59_spill] sm:$0xff]  ;;  %v3598_v18 = vmax.f32 %v3266_v53, 0.0 }
 0x19e   : > { %v1233_v39 = vmul.f32 %v3016_v59, %v1200_v29  ;;  %v3553_v5 = vmax.f32 %v1023_v54, 0.0  ;;  %v3555_v43 = vmax.f32 %v1087_v22, 0.0  ;;  %v3558_v52 = vmul.f32 %v1589_v40, %v4427_v57  ;;  %v4430_v54 = vld [vmem:[#allocation17_spill] sm:$0xff]  ;;  %v4442_v53 = vld [vmem:[#allocation46_spill] sm:$0xff] }
 0x19f   : > { %v1590_v17 = vmul.f32 %v4428_v11, %v1430_v36  ;;  %v992_v61 = vmul.f32 %v2974_v28, %v959_v15  ;;  %v1264_v4 = vmul.f32 %v3433_v45, %v4396_v14  ;;  %v1265_v31 = vmul.f32 %v3453_v60, %v4400_v24  ;;  %v4433_v15 = vld [vmem:[#allocation19_spill] sm:$0xff]  ;;  %4436 = vst [vmem:[#allocation71_spill] sm:$0xff] %v3598_v18 }
 0x1a0   : > { %4425 = vst [vmem:[#allocation50_spill] sm:$0xff] %v3553_v5  ;;  %4426 = vst [vmem:[#allocation68_spill] sm:$0xff] %v3555_v43  ;;  %v3568_v47 = vmul.f32 %v4429_v37, %v4429_v37  ;;  %vm1555_vm8 = vcmp.gt.f32.partialorder %v4430_v54, %v3547_v3  ;;  %v3577_v29 = vmul.f32 %v4432_v46, %v4432_v46  ;;  %v4438_v5 = vld [vmem:[#allocation62_spill] sm:$0xff] }
 0x1a1   : > { %v3573_v40 = vmul.f32 %v1590_v17, %v4431_v32  ;;  %v1201_v22 = vmul.f32 %v1137_v35, %v4412_v48  ;;  %v1202_v14 = vmul.f32 %v1138_v1, %v4419_v12  ;;  %v1024_v45 = vsub.f32 1.0, %v992_v61 }
 0x1a2   : > { %v1088_v24 = vsub.f32 0.5, %v992_v61  ;;  %v1297_v60 = vmul.f32 %v3119_v26, %v1264_v4  ;;  %v1298_v36 = vmul.f32 %v3119_v26, %v1265_v31  ;;  %vm1556_vm9 = vcmp.gt.f32.partialorder %v4433_v15, %v3547_v3  ;;  %v1492_v4 = vpop.permute.xlu0 %1491 }
 0x1a3   : > { %v1366_v57 = vmul.f32 %v2998_v44, %v3577_v29  ;;  %v1399_v11 = vmul.f32 %v3013_v58, %v3568_v47  ;;  %v1234_v17 = vmul.f32 %v3016_v59, %v1201_v22  ;;  %v1235_v48 = vmul.f32 %v3016_v59, %v1202_v14 }
 0x1a4   : > { %v3591_v35 = vmax.f32 %v1024_v45, 0.0  ;;  %v3593_v12 = vmax.f32 %v1088_v24, 0.0  ;;  %v1329_v1 = vsub.f32 %v1232_v56, %v1297_v60  ;;  %v1330_v61 = vsub.f32 %v1233_v39, %v1298_v36  ;;  %v4439_v45 = vld [vmem:[#allocation63_spill] sm:$0xff]  ;;  %v4441_v39 = vld [vmem:[#allocation21_spill] sm:$0xff] }
 0x1a5   : > { %v1431_v31 = vsub.f32 %v1366_v57, %v1399_v11  ;;  %v1266_v32 = vmul.f32 %v1169_v55, %v4415_v20  ;;  %v1267_v63 = vmul.f32 %v1170_v49, %v4420_v23  ;;  %v3600_v43 = vpop.eup %2450  ;;  %v1140_v14 = vmul.f32 %v4438_v5, %v4438_v5 }
 0x1a6   : > { %4434 = vst [vmem:[#allocation52_spill] sm:$0xff] %v3591_v35  ;;  %4435 = vst [vmem:[#allocation53_spill] sm:$0xff] %v3593_v12  ;;  %v1702_v22 = vadd.f32 %v1330_v61, %v1329_v1  ;;  %v3606_v24 = vmul.f32 %v4439_v45, %v4439_v45  ;;  %v3609_v56 = vmax.f32 %v3273_v19, 0.0  ;;  %vm1557_vm10 = vcmp.gt.f32.partialorder %v4441_v39, %v1492_v4  ;;  %v3617_v60 = vpop.eup %2452 }
 0x1a7   : > { %4437 = vst [vmem:[#allocation35_spill] sm:$0xff] %v3600_v43  ;;  %v960_v20 = vmul.f32 %v3600_v43, %v3523_v33  ;;  %v1591_v55 = vmul.f32 %v4442_v53, %v1431_v31  ;;  %v1299_v23 = vmul.f32 %v3119_v26, %v1266_v32  ;;  %v1300_v49 = vmul.f32 %v3119_v26, %v1267_v63  ;;  %v4443_v31 = vld [vmem:[#allocation24_spill] sm:$0xff] }
 0x1a8   : > { %4440 = vst [vmem:[#allocation20_spill] sm:$0xff] %v3609_v56  ;;  %1703 = vadd.xlane.f32.xlu0 %v1702_v22  ;;  %v898_v36 = vmax.f32 %v3598_v18, 1e-30  ;;  %v1367_v19 = vmul.f32 %v2998_v44, %v3606_v24  ;;  %v1400_v57 = vmul.f32 %v3013_v58, %v1140_v14  ;;  %v899_v11 = vmax.f32 %v3609_v56, 1e-30 }
 0x1a9   : > { %v993_v1 = vmul.f32 %v2974_v28, %v960_v20  ;;  %v961_v61 = vmul.f32 %v3617_v60, %v3535_v10  ;;  %v3628_v32 = vmul.f32 %v1591_v55, %v4443_v31  ;;  %v1331_v63 = vsub.f32 %v1234_v17, %v1299_v23 }
 0x1aa   : > { %v1332_v53 = vsub.f32 %v1235_v48, %v1300_v49  ;;  %2454 = vrsqrt.f32 %v898_v36  ;;  %v1432_v22 = vsub.f32 %v1367_v19, %v1400_v57  ;;  %v1651_v33 = vsel %vm1555_vm8, %v3480_v6, 0.0  ;;  %v4445_v48 = vld [vmem:[#allocation73_spill] sm:$0xff] }
 0x1ab   : > { %v1025_v43 = vsub.f32 1.0, %v993_v1  ;;  %v1089_v12 = vsub.f32 0.5, %v993_v1  ;;  %v994_v35 = vmul.f32 %v2974_v28, %v961_v61  ;;  %2456 = vrsqrt.f32 %v899_v11  ;;  %v4446_v36 = vld [vmem:[#allocation25_spill] sm:$0xff] }
 0x1ac   : > { %v1705_v20 = vadd.f32 %v1332_v53, %v1331_v63  ;;  %v1592_v10 = vmul.f32 %v4444_v13, %v1432_v22  ;;  %v1652_v17 = vsel %vm1556_vm9, %v3497_v51, 0.0  ;;  %v1141_v55 = vmul.f32 %v4445_v48, %v4445_v48  ;;  %v4447_v13 = vld [vmem:[#allocation74_spill] sm:$0xff] }
 0x1ad   : > { %v3642_v23 = vmax.f32 %v1025_v43, 0.0  ;;  %v3644_v54 = vmax.f32 %v1089_v12, 0.0  ;;  %v1026_v6 = vsub.f32 1.0, %v994_v35  ;;  %v1090_v49 = vsub.f32 0.5, %v994_v35  ;;  %v4448_v43 = vld [vmem:[#allocation23_spill] sm:$0xff] }
 0x1ae   : > { %1706 = vadd.xlane.f32.xlu1 %v1705_v20  ;;  %v3647_v19 = vmul.f32 %v1592_v10, %v4446_v36  ;;  %v1799_v57 = vadd.f32 %v1652_v17, %v1651_v33  ;;  %v3651_v11 = vmul.f32 %v4447_v13, %v4447_v13  ;;  %v1401_v51 = vmul.f32 %v3013_v58, %v1141_v55  ;;  %v4452_v36 = vld [vmem:[#allocation26_spill] sm:$0xff] }
 0x1af   : > { %v3654_v3 = vmax.f32 %v1026_v6, 0.0  ;;  %v3656_v15 = vmax.f32 %v1090_v49, 0.0  ;;  %vm1558_vm11 = vcmp.gt.f32.partialorder %v4448_v43, %v1492_v4  ;;  %v1653_v35 = vsel %vm1557_vm10, %v3558_v52, 0.0  ;;  %v3677_v4 = vpop.permute.xlu1 %1496  ;;  %v4453_v43 = vld [vmem:[#allocation28_spill] sm:$0xff] }
 0x1b0   : > { %1800 = vadd.xlane.f32.xlu0 %v1799_v57  ;;  %v1368_v33 = vmul.f32 %v2998_v44, %v3651_v11  ;;  %v1654_v10 = vsel %vm1558_vm11, %v3573_v40, 0.0  ;;  %v3666_v12 = vmax.f32 %v3291_v8, 0.0  ;;  %v1142_v1 = vmul.f32 %v3278_v34, %v3278_v34 }
 0x1b1   : > { %v1802_v61 = vadd.f32 %v1654_v10, %v1653_v35  ;;  %v1174_v31 = vmul.f32 %v3280_v50, %v3280_v50  ;;  %v3673_v63 = vmax.f32 %v3301_v27, 0.0  ;;  %v1203_v52 = vmul.f32 %v3568_v47, %v4429_v37  ;;  %v4451_v47 = vld [vmem:[#allocation57_spill] sm:$0xff]  ;;  %v4454_v10 = vld [vmem:[#allocation67_spill] sm:$0xff] }
 0x1b2   : > { %4449 = vst [vmem:[#allocation36_spill] sm:$0xff] %v3666_v12  ;;  %v1433_v39 = vsub.f32 %v1368_v33, %v1401_v51  ;;  %v900_v40 = vmax.f32 %v3666_v12, 1e-30  ;;  %v1402_v8 = vmul.f32 %v3013_v58, %v1142_v1  ;;  %v1204_v53 = vmul.f32 %v1140_v14, %v4438_v5 }
 0x1b3   : > { %4450 = vst [vmem:[#allocation58_spill] sm:$0xff] %v3673_v63  ;;  %1803 = vadd.xlane.f32.xlu1 %v1802_v61  ;;  %v1369_v22 = vmul.f32 %v2998_v44, %v1174_v31  ;;  %v901_v20 = vmax.f32 %v3673_v63, 1e-30  ;;  %v1236_v27 = vmul.f32 %v3016_v59, %v1203_v52  ;;  %v1268_v17 = vmul.f32 %v3577_v29, %v4432_v46 }
 0x1b4   : > { %v3687_v37 = vpop.eup %2454  ;;  %v1593_v6 = vmul.f32 %v4451_v47, %v1433_v39  ;;  %2458 = vrsqrt.f32 %v900_v40  ;;  %v1237_v49 = vmul.f32 %v3016_v59, %v1204_v53  ;;  %v1269_v5 = vmul.f32 %v3606_v24, %v4439_v45 }
 0x1b5   : > { %v3693_v14 = vpop.eup %2456  ;;  %vm1559_vm12 = vcmp.gt.f32.partialorder %v4452_v36, %v3677_v4  ;;  %v962_v57 = vmul.f32 %v3687_v37, %v3598_v18  ;;  %v1434_v51 = vsub.f32 %v1369_v22, %v1402_v8  ;;  %2460 = vrsqrt.f32 %v901_v20  ;;  %v4455_v20 = vld [vmem:[#allocation27_spill] sm:$0xff] }
 0x1b6   : > { %v1301_v46 = vmul.f32 %v3119_v26, %v1268_v17  ;;  %v963_v29 = vmul.f32 %v3693_v14, %v3609_v56  ;;  %v3703_v35 = vmul.f32 %v1593_v6, %v4453_v43  ;;  %v1302_v45 = vmul.f32 %v3119_v26, %v1269_v5  ;;  %v4456_v6 = vld [vmem:[#allocation29_spill] sm:$0xff] }
 0x1b7   : > { %v3708_v24 = vmul.f32 %v3286_v38, %v3286_v38  ;;  %v995_v33 = vmul.f32 %v2974_v28, %v962_v57  ;;  %v1594_v61 = vmul.f32 %v4454_v10, %v1434_v51  ;;  %v3714_v39 = vmul.f32 %v3288_v41, %v3288_v41 }
 0x1b8   : > { %v1333_v52 = vsub.f32 %v1236_v27, %v1301_v46  ;;  %v996_v40 = vmul.f32 %v2974_v28, %v963_v29  ;;  %v1334_v8 = vsub.f32 %v1237_v49, %v1302_v45  ;;  %v1205_v22 = vmul.f32 %v1141_v55, %v4445_v48 }
 0x1b9   : > { %v1403_v53 = vmul.f32 %v3013_v58, %v3708_v24  ;;  %vm1560_vm13 = vcmp.gt.f32.partialorder %v4455_v20, %v3677_v4  ;;  %v1027_v17 = vsub.f32 1.0, %v995_v33  ;;  %v1091_v47 = vsub.f32 0.5, %v995_v33  ;;  %v4462_v4 = vld [vmem:[#allocation84_spill] sm:$0xff] }
 0x1ba   : > { %v3723_v5 = vmul.f32 %v1594_v61, %v4456_v6  ;;  %v1370_v27 = vmul.f32 %v2998_v44, %v3714_v39  ;;  %v1028_v57 = vsub.f32 1.0, %v996_v40  ;;  %v1092_v51 = vsub.f32 0.5, %v996_v40 }
 0x1bb   : > { %v1708_v46 = vadd.f32 %v1334_v8, %v1333_v52  ;;  %v1206_v49 = vmul.f32 %v1142_v1, %v3278_v34  ;;  %v3728_v29 = vmax.f32 %v1027_v17, 0.0  ;;  %v3730_v43 = vmax.f32 %v1091_v47, 0.0  ;;  %v4457_v52 = vld [vmem:[#allocation70_spill] sm:$0xff] }
 0x1bc   : > { %v1435_v48 = vsub.f32 %v1370_v27, %v1403_v53  ;;  %v1238_v55 = vmul.f32 %v3016_v59, %v1205_v22  ;;  %v3733_v45 = vmax.f32 %v1028_v57, 0.0  ;;  %v3735_v33 = vmax.f32 %v1092_v51, 0.0 }
 0x1bd   : > { %1709 = vadd.xlane.f32.xlu0 %v1708_v46  ;;  %v1239_v10 = vmul.f32 %v3016_v59, %v1206_v49  ;;  %v1270_v61 = vmul.f32 %v3651_v11, %v4447_v13  ;;  %v1271_v34 = vmul.f32 %v1174_v31, %v3280_v50  ;;  %v3743_v1 = vmax.f32 %v3326_v25, 0.0  ;;  %v4460_v11 = vld [vmem:[#allocation32_spill] sm:$0xff] }
 0x1be   : > { %v1595_v40 = vmul.f32 %v4457_v52, %v1435_v48  ;;  %v1144_v8 = vmul.f32 %v3316_v0, %v3316_v0  ;;  %v3747_v53 = vpop.eup %2458  ;;  %v1176_v17 = vmul.f32 %v3318_v21, %v3318_v21  ;;  %v3753_v47 = vmax.f32 %v3337_v9, 0.0 }
 0x1bf   : > { %4458 = vst [vmem:[#allocation17_spill] sm:$0xff] %v3743_v1  ;;  %v1303_v22 = vmul.f32 %v3119_v26, %v1270_v61  ;;  %v1655_v50 = vsel %vm1559_vm12, %v3628_v32, 0.0  ;;  %v3759_v25 = vpop.eup %2460  ;;  %v964_v13 = vmul.f32 %v3747_v53, %v3666_v12  ;;  %v1304_v6 = vmul.f32 %v3119_v26, %v1271_v34  ;;  %v4471_v12 = vld [vmem:[#allocation38_spill] sm:$0xff] }
 0x1c0   : > { %4459 = vst [vmem:[#allocation22_spill] sm:$0xff] %v3753_v47  ;;  %v3764_v31 = vmul.f32 %v1595_v40, %v4460_v11  ;;  %v902_v27 = vmax.f32 %v3743_v1, 1e-30  ;;  %v965_v9 = vmul.f32 %v3759_v25, %v3673_v63  ;;  %v1371_v51 = vmul.f32 %v2998_v44, %v1176_v17  ;;  %v4461_v11 = vld [vmem:[#allocation75_spill] sm:$0xff]  ;;  %v1502_v63 = vpop.permute.xlu0 %1501 }
 0x1c1   : > { %v1335_v57 = vsub.f32 %v1238_v55, %v1303_v22  ;;  %v1404_v32 = vmul.f32 %v3013_v58, %v1144_v8  ;;  %v997_v36 = vmul.f32 %v2974_v28, %v964_v13  ;;  %v1336_v46 = vsub.f32 %v1239_v10, %v1304_v6 }
 0x1c2   : > { %2462 = vrsqrt.f32 %v902_v27  ;;  %v903_v49 = vmax.f32 %v3753_v47, 1e-30  ;;  %v998_v48 = vmul.f32 %v2974_v28, %v965_v9  ;;  %v1656_v52 = vsel %vm1560_vm13, %v3647_v19, 0.0 }
 0x1c3   : > { %v1436_v61 = vsub.f32 %v1371_v51, %v1404_v32  ;;  %v1145_v55 = vmul.f32 %v3351_v62, %v3351_v62  ;;  %v1029_v40 = vsub.f32 1.0, %v997_v36  ;;  %v1093_v34 = vsub.f32 0.5, %v997_v36  ;;  %v4463_v36 = vld [vmem:[#allocation34_spill] sm:$0xff] }
 0x1c4   : > { %v1711_v22 = vadd.f32 %v1336_v46, %v1335_v57  ;;  %2464 = vrsqrt.f32 %v903_v49  ;;  %v1030_v13 = vsub.f32 1.0, %v998_v48  ;;  %v1094_v10 = vsub.f32 0.5, %v998_v48  ;;  %v4465_v48 = vld [vmem:[#allocation41_spill] sm:$0xff] }
 0x1c5   : > { %v1596_v6 = vmul.f32 %v4461_v11, %v1436_v61  ;;  %v1805_v27 = vadd.f32 %v1656_v52, %v1655_v50  ;;  %v3782_v9 = vmax.f32 %v1029_v40, 0.0  ;;  %v3784_v51 = vmax.f32 %v1093_v34, 0.0  ;;  %v4464_v50 = vld [vmem:[#allocation33_spill] sm:$0xff] }
 0x1c6   : > { %1712 = vadd.xlane.f32.xlu1 %v1711_v22  ;;  %v1177_v19 = vmul.f32 %v4462_v4, %v4462_v4  ;;  %v1405_v20 = vmul.f32 %v3013_v58, %v1145_v55  ;;  %v3789_v32 = vmax.f32 %v1030_v13, 0.0  ;;  %v3791_v57 = vmax.f32 %v1094_v10, 0.0 }
 0x1c7   : > { %v3794_v46 = vmul.f32 %v1596_v6, %v4463_v36  ;;  %1806 = vadd.xlane.f32.xlu0 %v1805_v27  ;;  %vm1561_vm14 = vcmp.gt.f32.partialorder %v4464_v50, %v1502_v63  ;;  %vm1562_vm15 = vcmp.gt.f32.partialorder %v4465_v48, %v1502_v63  ;;  %v1146_v52 = vmul.f32 %v3387_v2, %v3387_v2 }
 0x1c8   : > { %v1372_v49 = vmul.f32 %v2998_v44, %v1177_v19  ;;  %v1657_v61 = vsel %vm1561_vm14, %v3703_v35, 0.0  ;;  %v1658_v40 = vsel %vm1562_vm15, %v3723_v5, 0.0  ;;  %v1178_v34 = vmul.f32 %v3389_v42, %v3389_v42 }
 0x1c9   : > { %v1207_v22 = vmul.f32 %v3708_v24, %v3286_v38  ;;  %v1208_v13 = vmul.f32 %v1144_v8, %v3316_v0  ;;  %v1808_v11 = vadd.f32 %v1658_v40, %v1657_v61  ;;  %v1406_v6 = vmul.f32 %v3013_v58, %v1146_v52  ;;  %v1507_v38 = vpop.permute.xlu1 %1506  ;;  %v4467_v24 = vld [vmem:[#allocation78_spill] sm:$0xff]  ;;  %v4469_v40 = vld [vmem:[#allocation37_spill] sm:$0xff] }
 0x1ca   : > { %v1437_v10 = vsub.f32 %v1372_v49, %v1405_v20  ;;  %v1272_v63 = vmul.f32 %v3714_v39, %v3288_v41  ;;  %v1373_v35 = vmul.f32 %v2998_v44, %v1178_v34  ;;  %v1273_v36 = vmul.f32 %v1176_v17, %v3318_v21  ;;  %v4468_v39 = vld [vmem:[#allocation44_spill] sm:$0xff] }
 0x1cb   : > { %v1240_v27 = vmul.f32 %v3016_v59, %v1207_v22  ;;  %v1241_v5 = vmul.f32 %v3016_v59, %v1208_v13  ;;  %1809 = vadd.xlane.f32.xlu1 %v1808_v11  ;;  %v3821_v20 = vmul.f32 %v3461_v30, %v3461_v30  ;;  %v3825_v41 = vmul.f32 %v3463_v16, %v3463_v16 }
 0x1cc   : > { %v3815_v50 = vpop.eup %2462  ;;  %v1597_v0 = vmul.f32 %v4467_v24, %v1437_v10  ;;  %v1305_v8 = vmul.f32 %v3119_v26, %v1272_v63  ;;  %vm1563_vm0 = vcmp.gt.f32.partialorder %v4468_v39, %v1507_v38  ;;  %v1438_v17 = vsub.f32 %v1373_v35, %v1406_v6  ;;  %v4470_v35 = vld [vmem:[#allocation82_spill] sm:$0xff] }
 0x1cd   : > { %4466 = vst [vmem:[#allocation59_spill] sm:$0xff] %v3815_v50  ;;  %v966_v21 = vmul.f32 %v3815_v50, %v3743_v1  ;;  %v1306_v49 = vmul.f32 %v3119_v26, %v1273_v36  ;;  %v1209_v48 = vmul.f32 %v1145_v55, %v3351_v62  ;;  %v1374_v10 = vmul.f32 %v2998_v44, %v3825_v41  ;;  %v4472_v50 = vld [vmem:[#allocation89_spill] sm:$0xff] }
 0x1ce   : > { %v3832_v61 = vpop.eup %2464  ;;  %v1629_v22 = vmul.f32 %v1597_v0, %v4469_v40  ;;  %v1337_v13 = vsub.f32 %v1240_v27, %v1305_v8  ;;  %v1407_v11 = vmul.f32 %v3013_v58, %v3821_v20  ;;  %v1598_v36 = vmul.f32 %v4470_v35, %v1438_v17 }
 0x1cf   : > { %v999_v63 = vmul.f32 %v2974_v28, %v966_v21  ;;  %v967_v6 = vmul.f32 %v3832_v61, %v3753_v47  ;;  %v1338_v24 = vsub.f32 %v1241_v5, %v1306_v49  ;;  %v1210_v55 = vmul.f32 %v1146_v52, %v3387_v2 }
 0x1d0   : > { %v1439_v62 = vsub.f32 %v1374_v10, %v1407_v11  ;;  %v1242_v0 = vmul.f32 %v3016_v59, %v1209_v48  ;;  %v1274_v27 = vmul.f32 %v1177_v19, %v4462_v4  ;;  %v1630_v56 = vmul.f32 %v1598_v36, %v4471_v12  ;;  %v4473_v4 = vld [vmem:[#allocation47_spill] sm:$0xff]  ;;  %v4475_v10 = vld [vmem:[#allocation45_spill] sm:$0xff] }
 0x1d1   : > { %v1031_v8 = vsub.f32 1.0, %v999_v63  ;;  %v1095_v40 = vsub.f32 0.5, %v999_v63  ;;  %v1000_v1 = vmul.f32 %v2974_v28, %v967_v6  ;;  %v1714_v21 = vadd.f32 %v1338_v24, %v1337_v13  ;;  %v1512_v6 = vpop.permute.xlu0 %1511  ;;  %v4476_v24 = vld [vmem:[#allocation42_spill] sm:$0xff] }
 0x1d2   : > { %v1599_v18 = vmul.f32 %v4472_v50, %v1439_v62  ;;  %v1243_v47 = vmul.f32 %v3016_v59, %v1210_v55  ;;  %v1275_v5 = vmul.f32 %v1178_v34, %v3389_v42  ;;  %v1307_v28 = vmul.f32 %v3119_v26, %v1274_v27  ;;  %v4474_v34 = vld [vmem:[#allocation60_spill] sm:$0xff]  ;;  %v4477_v55 = vld [vmem:[#allocation43_spill] sm:$0xff] }
 0x1d3   : > { %v3851_v17 = vmax.f32 %v1031_v8, 0.0  ;;  %v3853_v2 = vmax.f32 %v1095_v40, 0.0  ;;  %v1032_v52 = vsub.f32 1.0, %v1000_v1  ;;  %v1096_v49 = vsub.f32 0.5, %v1000_v1  ;;  %1715 = vadd.xlane.f32.xlu0 %v1714_v21  ;;  %v4479_v40 = vld [vmem:[#allocation66_spill] sm:$0xff] }
 0x1d4   : > { %v3856_v19 = vmul.f32 %v1599_v18, %v4473_v4  ;;  %v1308_v12 = vmul.f32 %v3119_v26, %v1275_v5  ;;  %v1148_v50 = vmul.f32 %v3471_v7, %v3471_v7  ;;  %v1180_v13 = vmul.f32 %v4474_v34, %v4474_v34  ;;  %v4480_v5 = vld [vmem:[#allocation30_spill] sm:$0xff] }
 0x1d5   : > { %v3862_v48 = vmax.f32 %v1032_v52, 0.0  ;;  %v3864_v42 = vmax.f32 %v1096_v49, 0.0  ;;  %vm1564_vm1 = vcmp.gt.f32.partialorder %v4475_v10, %v1507_v38  ;;  %v1339_v1 = vsub.f32 %v1242_v0, %v1307_v28  ;;  %v4481_v49 = vld [vmem:[#allocation64_spill] sm:$0xff] }
 0x1d6   : > { %v1340_v11 = vsub.f32 %v1243_v47, %v1308_v12  ;;  %v1408_v18 = vmul.f32 %v3013_v58, %v1148_v50  ;;  %v1659_v63 = vsel %vm1563_vm0, %v3764_v31, 0.0  ;;  %v1375_v35 = vmul.f32 %v2998_v44, %v1180_v13  ;;  %v4478_v47 = vld [vmem:[#allocation55_spill] sm:$0xff]  ;;  %v4482_v12 = vld [vmem:[#allocation90_spill] sm:$0xff] }
 0x1d7   : > { %v1660_v36 = vsel %vm1564_vm1, %v3794_v46, 0.0  ;;  %v1149_v62 = vmul.f32 %v4476_v24, %v4476_v24  ;;  %v1181_v27 = vmul.f32 %v4477_v55, %v4477_v55  ;;  %vm1565_vm2 = vcmp.gt.f32.partialorder %v4478_v47, %v1512_v6 }
 0x1d8   : > { %v1717_v8 = vadd.f32 %v1340_v11, %v1339_v1  ;;  %v1811_v0 = vadd.f32 %v1660_v36, %v1659_v63  ;;  %vm1566_vm3 = vcmp.gt.f32.partialorder %v4479_v40, %v1512_v6  ;;  %v1440_v21 = vsub.f32 %v1375_v35, %v1408_v18  ;;  %v4483_v35 = vld [vmem:[#allocation51_spill] sm:$0xff] }
 0x1d9   : > { %v1376_v31 = vmul.f32 %v2998_v44, %v1181_v27  ;;  %v1409_v38 = vmul.f32 %v3013_v58, %v1149_v62  ;;  %v1661_v39 = vsel %vm1565_vm2, %v1629_v22, 0.0  ;;  %v1662_v46 = vsel %vm1566_vm3, %v1630_v56, 0.0 }
 0x1da   : > { %1718 = vadd.xlane.f32.xlu1 %v1717_v8  ;;  %1812 = vadd.xlane.f32.xlu0 %v1811_v0  ;;  %v1150_v52 = vmul.f32 %v4480_v5, %v4480_v5  ;;  %v1182_v4 = vmul.f32 %v4481_v49, %v4481_v49  ;;  %v1211_v28 = vmul.f32 %v3821_v20, %v3461_v30  ;;  %v4484_v8 = vld [vmem:[#allocation14_spill] sm:$0xff]  ;;  %vm1757_vm2 = vcmask 7168  }
 0x1db   : > { %v1600_v10 = vmul.f32 %v4482_v12, %v1440_v21  ;;  %v1441_v1 = vsub.f32 %v1376_v31, %v1409_v38  ;;  %v1814_v11 = vadd.f32 %v1662_v46, %v1661_v39  ;;  %v1212_v18 = vmul.f32 %v1148_v50, %v3471_v7  ;;  %v4485_v50 = vld [vmem:[#allocation50_spill] sm:$0xff]  ;;  %v4486_v21 = vld [vmem:[#allocation68_spill] sm:$0xff] }
 0x1dc   : > { %v1377_v22 = vmul.f32 %v2998_v44, %v1182_v4  ;;  %v1410_v63 = vmul.f32 %v3013_v58, %v1150_v52  ;;  %v1244_v56 = vmul.f32 %v3016_v59, %v1211_v28  ;;  %v1276_v6 = vmul.f32 %v3825_v41, %v3463_v16  ;;  %v4487_v38 = vld [vmem:[#allocation54_spill] sm:$0xff]  ;;  %v4488_v28 = vld [vmem:[#allocation40_spill] sm:$0xff] }
 0x1dd   : > { %v1632_v36 = vmul.f32 %v1600_v10, %v4483_v35  ;;  %v1601_v0 = vmul.f32 %v4484_v8, %v1441_v1  ;;  %v1245_v30 = vmul.f32 %v3016_v59, %v1212_v18  ;;  %v1277_v20 = vmul.f32 %v1180_v13, %v4474_v34 }
 0x1de   : > { %1815 = vadd.xlane.f32.xlu1 %v1814_v11  ;;  %v1442_v47 = vsub.f32 %v1377_v22, %v1410_v63  ;;  %v1309_v7 = vmul.f32 %v3119_v26, %v1276_v6  ;;  %v1151_v40 = vmul.f32 %v4485_v50, %v4485_v50  ;;  %v1183_v31 = vmul.f32 %v4486_v21, %v4486_v21  ;;  %v1517_v63 = vpop.permute.xlu1 %1516  ;;  %v4489_v6 = vld [vmem:[#allocation56_spill] sm:$0xff] }
 0x1df   : > { %v1633_v16 = vmul.f32 %v1601_v0, %v4487_v38  ;;  %v1310_v41 = vmul.f32 %v3119_v26, %v1277_v20  ;;  %v1213_v39 = vmul.f32 %v1149_v62, %v4476_v24  ;;  %v1214_v46 = vmul.f32 %v1150_v52, %v4480_v5  ;;  %v4490_v5 = vld [vmem:[#allocation52_spill] sm:$0xff]  ;;  %v4491_v0 = vld [vmem:[#allocation53_spill] sm:$0xff] }
 0x1e0   : > { %v1602_v34 = vmul.f32 %v4488_v28, %v1442_v47  ;;  %v1341_v13 = vsub.f32 %v1244_v56, %v1309_v7  ;;  %v1378_v12 = vmul.f32 %v2998_v44, %v1183_v31  ;;  %v1411_v10 = vmul.f32 %v3013_v58, %v1151_v40  ;;  %v4492_v20 = vld [vmem:[#allocation80_spill] sm:$0xff]  ;;  %v4494_v38 = vld [vmem:[#allocation81_spill] sm:$0xff] }
 0x1e1   : > { %v1342_v1 = vsub.f32 %v1245_v30, %v1310_v41  ;;  %v1246_v11 = vmul.f32 %v3016_v59, %v1213_v39  ;;  %v1247_v18 = vmul.f32 %v3016_v59, %v1214_v46  ;;  %v1278_v22 = vmul.f32 %v1181_v27, %v4477_v55  ;;  %v4493_v47 = vld [vmem:[#allocation16_spill] sm:$0xff]  ;;  %v1522_v46 = vpop.permute.xlu0 %1521  ;;  %v4495_v28 = vld [vmem:[#allocation61_spill] sm:$0xff] }
 0x1e2   : > { %v1634_v35 = vmul.f32 %v1602_v34, %v4489_v6  ;;  %v1443_v24 = vsub.f32 %v1378_v12, %v1411_v10  ;;  %v1279_v62 = vmul.f32 %v1182_v4, %v4481_v49  ;;  %v1152_v52 = vmul.f32 %v4490_v5, %v4490_v5 }
 0x1e3   : > { %v1720_v56 = vadd.f32 %v1342_v1, %v1341_v13  ;;  %v1311_v8 = vmul.f32 %v3119_v26, %v1278_v22  ;;  %v1184_v30 = vmul.f32 %v4491_v0, %v4491_v0  ;;  %vm1567_vm4 = vcmp.gt.f32.partialorder %v4492_v20, %v1517_v63 }
 0x1e4   : > { %v1603_v7 = vmul.f32 %v4493_v47, %v1443_v24  ;;  %v1312_v55 = vmul.f32 %v3119_v26, %v1279_v62  ;;  %v1412_v27 = vmul.f32 %v3013_v58, %v1152_v52  ;;  %vm1568_vm5 = vcmp.gt.f32.partialorder %v4494_v38, %v1517_v63  ;;  %v4496_v63 = vld [vmem:[#allocation85_spill] sm:$0xff] }
 0x1e5   : > { %1721 = vadd.xlane.f32.xlu0 %v1720_v56  ;;  %v1343_v49 = vsub.f32 %v1246_v11, %v1311_v8  ;;  %v1379_v4 = vmul.f32 %v2998_v44, %v1184_v30  ;;  %v1663_v41 = vsel %vm1567_vm4, %v3856_v19, 0.0  ;;  %v1664_v39 = vsel %vm1568_vm5, %v1632_v36, 0.0  ;;  %v4497_v11 = vld [vmem:[#allocation87_spill] sm:$0xff]  ;;  %v4498_v62 = vld [vmem:[#allocation49_spill] sm:$0xff] }
 0x1e6   : > { %v3930_v34 = vmul.f32 %v1603_v7, %v4495_v28  ;;  %v1344_v13 = vsub.f32 %v1247_v18, %v1312_v55  ;;  %v1817_v12 = vadd.f32 %v1664_v39, %v1663_v41  ;;  %v1153_v10 = vmul.f32 %v3642_v23, %v3642_v23 }
 0x1e7   : > { %v1444_v1 = vsub.f32 %v1379_v4, %v1412_v27  ;;  %v1185_v22 = vmul.f32 %v3644_v54, %v3644_v54  ;;  %vm1569_vm6 = vcmp.gt.f32.partialorder %v4496_v63, %v1522_v46  ;;  %vm1570_vm7 = vcmp.gt.f32.partialorder %v4497_v11, %v1522_v46 }
 0x1e8   : > { %v1723_v6 = vadd.f32 %v1344_v13, %v1343_v49  ;;  %v1413_v19 = vmul.f32 %v3013_v58, %v1153_v10  ;;  %v1665_v36 = vsel %vm1569_vm6, %v1633_v16, 0.0  ;;  %v1666_v24 = vsel %vm1570_vm7, %v1634_v35, 0.0  ;;  %v4499_v35 = vld [vmem:[#allocation65_spill] sm:$0xff] }
 0x1e9   : > { %v1604_v56 = vmul.f32 %v4498_v62, %v1444_v1  ;;  %1818 = vadd.xlane.f32.xlu0 %v1817_v12  ;;  %v1380_v18 = vmul.f32 %v2998_v44, %v1185_v22  ;;  %v1820_v8 = vadd.f32 %v1666_v24, %v1665_v36  ;;  %v1154_v20 = vmul.f32 %v3654_v3, %v3654_v3  ;;  %v4501_v12 = vld [vmem:[#allocation69_spill] sm:$0xff] }
 0x1ea   : > { %1724 = vadd.xlane.f32.xlu1 %v1723_v6  ;;  %v1186_v47 = vmul.f32 %v3656_v15, %v3656_v15  ;;  %v1215_v7 = vmul.f32 %v1151_v40, %v4485_v50  ;;  %v1216_v55 = vmul.f32 %v1152_v52, %v4490_v5  ;;  %v1280_v16 = vmul.f32 %v1183_v31, %v4486_v21  ;;  %v4500_v50 = vld [vmem:[#allocation35_spill] sm:$0xff] }
 0x1eb   : > { %v1636_v27 = vmul.f32 %v1604_v56, %v4499_v35  ;;  %v1445_v38 = vsub.f32 %v1380_v18, %v1413_v19  ;;  %v1414_v49 = vmul.f32 %v3013_v58, %v1154_v20  ;;  %v1281_v4 = vmul.f32 %v1184_v30, %v4491_v0  ;;  %v1527_v56 = vpop.permute.xlu1 %1526 }
 0x1ec   : > { %v1381_v41 = vmul.f32 %v2998_v44, %v1186_v47  ;;  %v1248_v39 = vmul.f32 %v3016_v59, %v1215_v7  ;;  %v1249_v46 = vmul.f32 %v3016_v59, %v1216_v55  ;;  %v1313_v28 = vmul.f32 %v3119_v26, %v1280_v16  ;;  %v4503_v55 = vld [vmem:[#allocation15_spill] sm:$0xff] }
 0x1ed   : > { %v1605_v40 = vmul.f32 %v4500_v50, %v1445_v38  ;;  %v1314_v5 = vmul.f32 %v3119_v26, %v1281_v4  ;;  %v1155_v21 = vmul.f32 %v3728_v29, %v3728_v29  ;;  %v1187_v31 = vmul.f32 %v3730_v43, %v3730_v43  ;;  %v1532_v4 = vpop.permute.xlu0 %1531 }
 0x1ee   : > { %1821 = vadd.xlane.f32.xlu1 %v1820_v8  ;;  %v1446_v52 = vsub.f32 %v1381_v41, %v1414_v49  ;;  %v1345_v0 = vsub.f32 %v1248_v39, %v1313_v28  ;;  %v1217_v30 = vmul.f32 %v1153_v10, %v3642_v23  ;;  %v1218_v13 = vmul.f32 %v1154_v20, %v3654_v3  ;;  %v4502_v8 = vld [vmem:[#allocation72_spill] sm:$0xff] }
 0x1ef   : > { %v1637_v1 = vmul.f32 %v1605_v40, %v4501_v12  ;;  %v1346_v63 = vsub.f32 %v1249_v46, %v1314_v5  ;;  %v1382_v11 = vmul.f32 %v2998_v44, %v1187_v31  ;;  %v1415_v6 = vmul.f32 %v3013_v58, %v1155_v21  ;;  %v4505_v41 = vld [vmem:[#allocation76_spill] sm:$0xff]  ;;  %v4506_v5 = vld [vmem:[#allocation31_spill] sm:$0xff] }
 0x1f0   : > { %v1606_v19 = vmul.f32 %v3617_v60, %v1446_v52  ;;  %v1250_v36 = vmul.f32 %v3016_v59, %v1217_v30  ;;  %v1251_v24 = vmul.f32 %v3016_v59, %v1218_v13  ;;  %v1282_v62 = vmul.f32 %v1185_v22, %v3644_v54  ;;  %v4507_v52 = vld [vmem:[#allocation18_spill] sm:$0xff] }
 0x1f1   : > { %v1726_v18 = vadd.f32 %v1346_v63, %v1345_v0  ;;  %v1447_v23 = vsub.f32 %v1382_v11, %v1415_v6  ;;  %v1283_v3 = vmul.f32 %v1186_v47, %v3656_v15  ;;  %v1156_v10 = vmul.f32 %v3733_v45, %v3733_v45  ;;  %v4504_v15 = vld [vmem:[#allocation39_spill] sm:$0xff] }
 0x1f2   : > { %v1638_v20 = vmul.f32 %v1606_v19, %v4502_v8  ;;  %v1315_v7 = vmul.f32 %v3119_v26, %v1282_v62  ;;  %v1188_v60 = vmul.f32 %v3735_v33, %v3735_v33  ;;  %vm1571_vm8 = vcmp.gt.f32.partialorder %v4503_v55, %v1527_v56 }
 0x1f3   : > { %1727 = vadd.xlane.f32.xlu0 %v1726_v18  ;;  %v1607_v54 = vmul.f32 %v3687_v37, %v1447_v23  ;;  %v1316_v22 = vmul.f32 %v3119_v26, %v1283_v3  ;;  %v1416_v16 = vmul.f32 %v3013_v58, %v1156_v10  ;;  %vm1572_vm9 = vcmp.gt.f32.partialorder %v4504_v15, %v1527_v56 }
 0x1f4   : > { %v1347_v47 = vsub.f32 %v1250_v36, %v1315_v7  ;;  %v1383_v35 = vmul.f32 %v2998_v44, %v1188_v60  ;;  %v1667_v38 = vsel %vm1571_vm8, %v3930_v34, 0.0  ;;  %v1668_v49 = vsel %vm1572_vm9, %v1636_v27, 0.0 }
 0x1f5   : > { %v3985_v39 = vmul.f32 %v1607_v54, %v4505_v41  ;;  %v1348_v46 = vsub.f32 %v1251_v24, %v1316_v22  ;;  %v1823_v28 = vadd.f32 %v1668_v49, %v1667_v38  ;;  %v1157_v37 = vmul.f32 %v3782_v9, %v3782_v9  ;;  %v1537_v38 = vpop.permute.xlu1 %1536  ;;  %v4510_v41 = vld [vmem:[#allocation83_spill] sm:$0xff] }
 0x1f6   : > { %v1448_v50 = vsub.f32 %v1383_v35, %v1416_v16  ;;  %v1189_v40 = vmul.f32 %v3784_v51, %v3784_v51  ;;  %vm1573_vm10 = vcmp.gt.f32.partialorder %v4506_v5, %v1532_v4  ;;  %vm1574_vm11 = vcmp.gt.f32.partialorder %v4507_v52, %v1532_v4  ;;  %v1542_v52 = vpop.permute.xlu0 %1541 }
 0x1f7   : > { %v1729_v0 = vadd.f32 %v1348_v46, %v1347_v47  ;;  %1824 = vadd.xlane.f32.xlu0 %v1823_v28  ;;  %v1417_v34 = vmul.f32 %v3013_v58, %v1157_v37  ;;  %v1669_v27 = vsel %vm1573_vm10, %v1637_v1, 0.0  ;;  %v1670_v30 = vsel %vm1574_vm11, %v1638_v20, 0.0  ;;  %v4508_v1 = vld [vmem:[#allocation77_spill] sm:$0xff] }
 0x1f8   : > { %v1608_v13 = vmul.f32 %v3693_v14, %v1448_v50  ;;  %v1384_v12 = vmul.f32 %v2998_v44, %v1189_v40  ;;  %v1826_v63 = vadd.f32 %v1670_v30, %v1669_v27  ;;  %v1158_v11 = vmul.f32 %v3789_v32, %v3789_v32  ;;  %v4512_v50 = vld [vmem:[#allocation59_spill] sm:$0xff] }
 0x1f9   : > { %1730 = vadd.xlane.f32.xlu1 %v1729_v0  ;;  %v1190_v6 = vmul.f32 %v3791_v57, %v3791_v57  ;;  %v1219_v19 = vmul.f32 %v1155_v21, %v3728_v29  ;;  %v1220_v36 = vmul.f32 %v1156_v10, %v3733_v45  ;;  %v1284_v24 = vmul.f32 %v1187_v31, %v3730_v43 }
 0x1fa   : > { %v1640_v62 = vmul.f32 %v1608_v13, %v4508_v1  ;;  %v1449_v56 = vsub.f32 %v1384_v12, %v1417_v34  ;;  %v1418_v14 = vmul.f32 %v3013_v58, %v1158_v11  ;;  %v1285_v18 = vmul.f32 %v1188_v60, %v3735_v33  ;;  %v4509_v60 = vld [vmem:[#allocation79_spill] sm:$0xff]  ;;  %v4514_v13 = vld [vmem:[#allocation86_spill] sm:$0xff] }
 0x1fb   : > { %v1385_v23 = vmul.f32 %v2998_v44, %v1190_v6  ;;  %v1252_v3 = vmul.f32 %v3016_v59, %v1219_v19  ;;  %v1253_v8 = vmul.f32 %v3016_v59, %v1220_v36  ;;  %v1317_v20 = vmul.f32 %v3119_v26, %v1284_v24  ;;  %v4516_v36 = vld [vmem:[#allocation58_spill] sm:$0xff] }
 0x1fc   : > { %v1609_v29 = vmul.f32 %v3747_v53, %v1449_v56  ;;  %v1318_v45 = vmul.f32 %v3119_v26, %v1285_v18  ;;  %v1159_v43 = vmul.f32 %v3851_v17, %v3851_v17  ;;  %v1191_v21 = vmul.f32 %v3853_v2, %v3853_v2 }
 0x1fd   : > { %1827 = vadd.xlane.f32.xlu1 %v1826_v63  ;;  %v1450_v33 = vsub.f32 %v1385_v23, %v1418_v14  ;;  %v1349_v31 = vsub.f32 %v1252_v3, %v1317_v20  ;;  %v1221_v10 = vmul.f32 %v1157_v37, %v3782_v9  ;;  %v1222_v7 = vmul.f32 %v1158_v11, %v3789_v32  ;;  %v4511_v37 = vld [vmem:[#allocation71_spill] sm:$0xff]  ;;  %v4517_v20 = vld [vmem:[#allocation17_spill] sm:$0xff] }
 0x1fe   : > { %v1641_v55 = vmul.f32 %v1609_v29, %v4509_v60  ;;  %v1350_v54 = vsub.f32 %v1253_v8, %v1318_v45  ;;  %v1386_v53 = vmul.f32 %v2998_v44, %v1191_v21  ;;  %v1419_v22 = vmul.f32 %v3013_v58, %v1159_v43  ;;  %v4518_v29 = vld [vmem:[#allocation88_spill] sm:$0xff] }
 0x1ff   : > { %v1610_v16 = vmul.f32 %v3759_v25, %v1450_v33  ;;  %v1254_v15 = vmul.f32 %v3016_v59, %v1221_v10  ;;  %v1255_v47 = vmul.f32 %v3016_v59, %v1222_v7  ;;  %v1286_v35 = vmul.f32 %v1189_v40, %v3784_v51  ;;  %v1677_v10 = vld [vmem:[#allocation2] sm:$0xff] }
 0x200   : > { %v1732_v49 = vadd.f32 %v1350_v54, %v1349_v31  ;;  %v1451_v9 = vsub.f32 %v1386_v53, %v1419_v22  ;;  %v1287_v32 = vmul.f32 %v1190_v6, %v3791_v57  ;;  %v1160_v4 = vmul.f32 %v3862_v48, %v3862_v48  ;;  %v4513_v57 = vld [vmem:[#allocation20_spill] sm:$0xff]  ;;  %v1774_v7 = vld [vmem:[#allocation3] sm:$0xff] }
 0x201   : > { %v1642_v46 = vmul.f32 %v1610_v16, %v4510_v41  ;;  %v1319_v28 = vmul.f32 %v3119_v26, %v1286_v35  ;;  %v1192_v25 = vmul.f32 %v3864_v42, %v3864_v42  ;;  %vm1575_vm12 = vcmp.gt.f32.partialorder %v4511_v37, %v1537_v38  ;;  %v4515_v6 = vld [vmem:[#allocation36_spill] sm:$0xff]  ;;  %v1678_v16 = vld [vmem:[#allocation2 + $0x8] sm:$0xff] }
 0x202   : > { %1733 = vadd.xlane.f32.xlu0 %v1732_v49  ;;  %v1611_v51 = vmul.f32 %v4512_v50, %v1451_v9  ;;  %v1320_v40 = vmul.f32 %v3119_v26, %v1287_v32  ;;  %v1420_v5 = vmul.f32 %v3013_v58, %v1160_v4  ;;  %vm1576_vm13 = vcmp.gt.f32.partialorder %v4513_v57, %v1537_v38  ;;  %v1776_v35 = vld [vmem:[#allocation3 + $0x10] sm:$0xff]  ;;  %v1680_v41 = vld [vmem:[#allocation2 + $0x18] sm:$0xff]  ;;  %v1778_v57 = vld [vmem:[#allocation3 + $0x20] sm:$0xff] }
 0x203   : > { %v1351_v0 = vsub.f32 %v1254_v15, %v1319_v28  ;;  %v1387_v34 = vmul.f32 %v2998_v44, %v1192_v25  ;;  %v1671_v27 = vsel %vm1575_vm12, %v3985_v39, 0.0  ;;  %v1672_v30 = vsel %vm1576_vm13, %v1640_v62, 0.0  ;;  %v1547_v62 = vpop.permute.xlu1 %1546  ;;  %v1679_v9 = vld [vmem:[#allocation2 + $0x10] sm:$0xff]  ;;  %v1777_v50 = vld [vmem:[#allocation3 + $0x18] sm:$0xff] }
 0x204   : > { %v1643_v12 = vmul.f32 %v1611_v51, %v4514_v13  ;;  %v1352_v63 = vsub.f32 %v1255_v47, %v1320_v40  ;;  %v1829_v11 = vadd.f32 %v1672_v30, %v1671_v27  ;;  %vm1577_vm14 = vcmp.gt.f32.partialorder %v4515_v6, %v1542_v52  ;;  %v1683_v13 = vld [vmem:[#allocation2 + $0x30] sm:$0xff] }
 0x205   : > { %v1452_v19 = vsub.f32 %v1387_v34, %v1420_v5  ;;  %vm1578_vm15 = vcmp.gt.f32.partialorder %v4516_v36, %v1542_v52  ;;  %v1673_v24 = vsel %vm1577_vm14, %v1641_v55, 0.0  ;;  %v1223_v58 = vmul.f32 %v1159_v43, %v3851_v17  ;;  %v1682_v34 = vld [vmem:[#allocation2 + $0x28] sm:$0xff]  ;;  %v1780_v36 = vld [vmem:[#allocation3 + $0x30] sm:$0xff] }
 0x206   : > { %v1735_v1 = vadd.f32 %v1352_v63, %v1351_v0  ;;  %1830 = vadd.xlane.f32.xlu0 %v1829_v11  ;;  %v1674_v56 = vsel %vm1578_vm15, %v1642_v46, 0.0  ;;  %v1224_v44 = vmul.f32 %v1160_v4, %v3862_v48  ;;  %v1288_v39 = vmul.f32 %v1191_v21, %v3853_v2  ;;  %v4519_v21 = vld [vmem:[#allocation22_spill] sm:$0xff] }
 0x207   : > { %v1612_v14 = vmul.f32 %v3832_v61, %v1452_v19  ;;  %v1832_v18 = vadd.f32 %v1674_v56, %v1673_v24  ;;  %v1256_v23 = vmul.f32 %v3016_v59, %v1223_v58  ;;  %v1289_v3 = vmul.f32 %v1192_v25, %v3864_v42  ;;  %v1681_v25 = vld [vmem:[#allocation2 + $0x20] sm:$0xff] }
 0x208   : > { %1736 = vadd.xlane.f32.xlu1 %v1735_v1  ;;  %v1257_v8 = vmul.f32 %v3016_v59, %v1224_v44  ;;  %v1321_v17 = vmul.f32 %v3119_v26, %v1288_v39  ;;  %vm1579_vm0 = vcmp.gt.f32.partialorder %v4517_v20, %v1547_v62  ;;  %vm1580_vm1 = vcmp.gt.f32.partialorder %v4519_v21, %v1547_v62  ;;  %v1684_v1 = vld [vmem:[#allocation2 + $0x38] sm:$0xff]  ;;  %v1685_v39 = vld [vmem:[#allocation2 + $0x40] sm:$0xff] }
 0x209   : > { %v1644_v45 = vmul.f32 %v1612_v14, %v4518_v29  ;;  %v1322_v48 = vmul.f32 %v3119_v26, %v1289_v3  ;;  %v1675_v2 = vsel %vm1579_vm0, %v1643_v12, 0.0  ;;  %v1775_v26 = vld [vmem:[#allocation3 + $0x8] sm:$0xff]  ;;  %v1781_v62 = vld [vmem:[#allocation3 + $0x38] sm:$0xff] }
 0x20a   : > { %v1353_v43 = vsub.f32 %v1256_v23, %v1321_v17  ;;  %v1779_v12 = vld [vmem:[#allocation3 + $0x28] sm:$0xff] }
 0x20b   : > { %v1354_v61 = vsub.f32 %v1257_v8, %v1322_v48  ;;  %v1676_v33 = vsel %vm1580_vm1, %v1644_v45, 0.0  ;;  %v1782_v8 = vld [vmem:[#allocation3 + $0x40] sm:$0xff]  ;;  %v1686_v29 = vld [vmem:[#allocation2 + $0x48] sm:$0xff] }
 0x20c   : > { %1833 = vadd.xlane.f32.xlu1 %v1832_v18  ;;  %v1835_v31 = vadd.f32 %v1676_v33, %v1675_v2  ;;  %v1695_v59 = vpop.xlane.xlu0 %1694  ;;  %v1792_v60 = vpop.xlane.xlu1 %1791  ;;  %v1783_v2 = vld [vmem:[#allocation3 + $0x48] sm:$0xff] }
 0x20d   : > { %v1738_v42 = vadd.f32 %v1354_v61, %v1353_v43  ;;  %v1741_v55 = vadd.f32 %v1695_v59, %v1677_v10  ;;  %v1838_v54 = vadd.f32 %v1792_v60, %v1774_v7  ;;  %v1687_v43 = vld [vmem:[#allocation2 + $0x50] sm:$0xff]  ;;  %v1688_v59 = vld [vmem:[#allocation2 + $0x58] sm:$0xff] }
 0x20f   : > { %1739 = vadd.xlane.f32.xlu0 %v1738_v42  ;;  %1758 = vst.msk [vmem:[#allocation2] sm:$0xff] %vm1757_vm2, %v1741_v55  ;;  %1854 = vst.msk [vmem:[#allocation3] sm:$0xff] %vm1757_vm2, %v1838_v54  ;;  %v1784_v42 = vld [vmem:[#allocation3 + $0x50] sm:$0xff]  ;;  %v1785_v54 = vld [vmem:[#allocation3 + $0x58] sm:$0xff] }
 0x213   : > { %1836 = vadd.xlane.f32.xlu0 %v1835_v31 }
 0x216   : > { %v1795_v53 = vpop.xlane.xlu0 %1794 }
 0x217   : > { %v1839_v22 = vadd.f32 %v1795_v53, %v1775_v26  ;;  %v1689_v26 = vld [vmem:[#allocation2 + $0x60] sm:$0xff] }
 0x219   : > { %1855 = vst.msk [vmem:[#allocation3 + $0x8] sm:$0xff] %vm1757_vm2, %v1839_v22 }
 0x21a   : > { %v1698_v15 = vpop.xlane.xlu1 %1697 }
 0x21b   : > { %v1742_v47 = vadd.f32 %v1698_v15, %v1678_v16 }
 0x21d   : > { %1759 = vst.msk [vmem:[#allocation2 + $0x8] sm:$0xff] %vm1757_vm2, %v1742_v47  ;;  %v1786_v47 = vld [vmem:[#allocation3 + $0x60] sm:$0xff] }
 0x221   : > { %v1798_v38 = vpop.xlane.xlu1 %1797 }
 0x222   : > { %v1840_v49 = vadd.f32 %v1798_v38, %v1776_v35 }
 0x224   : > { %1856 = vst.msk [vmem:[#allocation3 + $0x10] sm:$0xff] %vm1757_vm2, %v1840_v49  ;;  %v1690_v49 = vld [vmem:[#allocation2 + $0x68] sm:$0xff] }
 0x22a   : > { %v1701_v32 = vpop.xlane.xlu0 %1700 }
 0x22b   : > { %v1743_v4 = vadd.f32 %v1701_v32, %v1679_v9 }
 0x22d   : > { %1760 = vst.msk [vmem:[#allocation2 + $0x10] sm:$0xff] %vm1757_vm2, %v1743_v4  ;;  %v1787_v4 = vld [vmem:[#allocation3 + $0x68] sm:$0xff] }
 0x235   : > { %v1704_v46 = vpop.xlane.xlu0 %1703 }
 0x236   : > { %v1744_v28 = vadd.f32 %v1704_v46, %v1680_v41  ;;  %v1691_v41 = vld [vmem:[#allocation2 + $0x70] sm:$0xff] }
 0x238   : > { %1761 = vst.msk [vmem:[#allocation2 + $0x18] sm:$0xff] %vm1757_vm2, %v1744_v28 }
 0x23b   : > { %v1707_v37 = vpop.xlane.xlu1 %1706 }
 0x23c   : > { %v1745_v51 = vadd.f32 %v1707_v37, %v1681_v25 }
 0x23d   : > { %v1801_v40 = vpop.xlane.xlu0 %1800 }
 0x23e   : > { %1762 = vst.msk [vmem:[#allocation2 + $0x20] sm:$0xff] %vm1757_vm2, %v1745_v51  ;;  %v1841_v5 = vadd.f32 %v1801_v40, %v1777_v50  ;;  %v1788_v50 = vld [vmem:[#allocation3 + $0x70] sm:$0xff] }
 0x240   : > { %1857 = vst.msk [vmem:[#allocation3 + $0x18] sm:$0xff] %vm1757_vm2, %v1841_v5  ;;  %v1804_v52 = vpop.xlane.xlu1 %1803  ;;  %v1692_v5 = vld [vmem:[#allocation2 + $0x78] sm:$0xff] }
 0x241   : > { %v1842_v0 = vadd.f32 %v1804_v52, %v1778_v57 }
 0x243   : > { %1858 = vst.msk [vmem:[#allocation3 + $0x20] sm:$0xff] %vm1757_vm2, %v1842_v0  ;;  %v1789_v0 = vld [vmem:[#allocation3 + $0x78] sm:$0xff] }
 0x24a   : > { %v1710_v27 = vpop.xlane.xlu0 %1709 }
 0x24b   : > { %v1746_v30 = vadd.f32 %v1710_v27, %v1682_v34 }
 0x24d   : > { %1763 = vst.msk [vmem:[#allocation2 + $0x28] sm:$0xff] %vm1757_vm2, %v1746_v30  ;;  %v1874_v30 = vld [vmem:[#allocation2] sm:$0xff] (!%p2265_p12) }
 0x253   : > { %v1713_v63 = vpop.xlane.xlu1 %1712 }
 0x254   : > { %v1747_v11 = vadd.f32 %v1713_v63, %v1683_v13  ;;  %v1807_v6 = vpop.xlane.xlu0 %1806  ;;  %v1875_v13 = vld [vmem:[#allocation2 + $0x8] sm:$0xff] (!%p2265_p12)  ;;  %v4088_v63 = vstv (!%p2265_p12), %s2810_s29 }
 0x255   : > { %v1843_v19 = vadd.f32 %v1807_v6, %v1779_v12  ;;  %v1876_v12 = vld [vmem:[#allocation2 + $0x10] sm:$0xff] (!%p2265_p12)  ;;  %v1891_v6 = vmul.f32 (!%p2265_p12), %v4088_v63, %v1874_v30 }
 0x256   : > { %1764 = vst.msk [vmem:[#allocation2 + $0x30] sm:$0xff] %vm1757_vm2, %v1747_v11  ;;  %v1877_v11 = vld [vmem:[#allocation2 + $0x18] sm:$0xff] (!%p2265_p12) }
 0x257   : > { %1859 = vst.msk [vmem:[#allocation3 + $0x28] sm:$0xff] %vm1757_vm2, %v1843_v19  ;;  %v1892_v19 = vmul.f32 (!%p2265_p12), %v4088_v63, %v1875_v13 }
 0x258   : > { %v1810_v24 = vpop.xlane.xlu1 %1809 }
 0x259   : > { %v1844_v58 = vadd.f32 %v1810_v24, %v1780_v36  ;;  %v1878_v36 = vld [vmem:[#allocation2 + $0x20] sm:$0xff] (!%p2265_p12)  ;;  %v1893_v24 = vmul.f32 (!%p2265_p12), %v4088_v63, %v1876_v12 }
 0x25a   : > { %v1927_v12 = vld [vmem:[#allocation3 + $0x20] sm:$0xff] (!%p2265_p12) }
 0x25b   : > { %1860 = vst.msk [vmem:[#allocation3 + $0x30] sm:$0xff] %vm1757_vm2, %v1844_v58  ;;  %v1894_v58 = vmul.f32 (!%p2265_p12), %v4088_v63, %v1877_v11 }
 0x260   : > { %v1716_v56 = vpop.xlane.xlu0 %1715 }
 0x261   : > { %v1748_v44 = vadd.f32 %v1716_v56, %v1684_v1  ;;  %v1879_v1 = vld [vmem:[#allocation2 + $0x28] sm:$0xff] (!%p2265_p12)  ;;  %v1895_v56 = vmul.f32 (!%p2265_p12), %v4088_v63, %v1878_v36 }
 0x263   : > { %1765 = vst.msk [vmem:[#allocation2 + $0x38] sm:$0xff] %vm1757_vm2, %v1748_v44  ;;  %v2266_v44 = vadd.f32 (!%p2265_p12), -1.0, %v1891_v6 }
 0x267   : > { %v1719_v14 = vpop.xlane.xlu1 %1718  ;;  %v1813_v18 = vpop.xlane.xlu0 %1812 }
 0x268   : > { %v1749_v23 = vadd.f32 %v1719_v14, %v1685_v39  ;;  %v1845_v3 = vadd.f32 %v1813_v18, %v1781_v62  ;;  %v2267_v39 = vadd.f32 (!%p2265_p12), -1.0, %v1892_v19  ;;  %v1880_v62 = vld [vmem:[#allocation2 + $0x30] sm:$0xff] (!%p2265_p12)  ;;  %v2268_v14 = vadd.f32 (!%p2265_p12), -1.0, %v1893_v24 }
 0x269   : > { %v1896_v18 = vmul.f32 (!%p2265_p12), %v4088_v63, %v1879_v1 }
 0x26a   : > { %1766 = vst.msk [vmem:[#allocation2 + $0x40] sm:$0xff] %vm1757_vm2, %v1749_v23  ;;  %1861 = vst.msk [vmem:[#allocation3 + $0x38] sm:$0xff] %vm1757_vm2, %v1845_v3  ;;  %v2269_v23 = vadd.f32 (!%p2265_p12), -1.0, %v1894_v58  ;;  %v1881_v3 = vld [vmem:[#allocation2 + $0x38] sm:$0xff] (!%p2265_p12) }
 0x26b   : > { %v1816_v17 = vpop.xlane.xlu1 %1815 }
 0x26c   : > { %v1846_v20 = vadd.f32 %v1816_v17, %v1782_v8  ;;  %v1897_v17 = vmul.f32 (!%p2265_p12), %v4088_v63, %v1880_v62 }
 0x26e   : > { %1862 = vst.msk [vmem:[#allocation3 + $0x40] sm:$0xff] %vm1757_vm2, %v1846_v20  ;;  %v2270_v20 = vadd.f32 (!%p2265_p12), -1.0, %v1895_v56 }
 0x271   : > { %v1882_v8 = vld [vmem:[#allocation2 + $0x40] sm:$0xff] (!%p2265_p12) }
 0x272   : > { %v1722_v45 = vpop.xlane.xlu0 %1721 }
 0x273   : > { %v1750_v48 = vadd.f32 %v1722_v45, %v1686_v29  ;;  %v1955_v29 = vand.u32 (!%p2265_p12), 2147483647, %v2266_v44  ;;  %v1956_v45 = vand.u32 (!%p2265_p12), 2147483647, %v2267_v39  ;;  %v1928_v44 = vld [vmem:[#allocation3 + $0x28] sm:$0xff] (!%p2265_p12) }
 0x275   : > { %1767 = vst.msk [vmem:[#allocation2 + $0x48] sm:$0xff] %vm1757_vm2, %v1750_v48  ;;  %v1957_v48 = vand.u32 (!%p2265_p12), 2147483647, %v2268_v14  ;;  %v1943_v14 = vmul.f32 (!%p2265_p12), %v1927_v12, %v4088_v63 }
 0x276   : > { %v1819_v21 = vpop.xlane.xlu0 %1818 }
 0x277   : > { %v1725_v61 = vpop.xlane.xlu1 %1724  ;;  %v1847_v33 = vadd.f32 %v1819_v21, %v1783_v2  ;;  %v2271_v21 = vadd.f32 (!%p2265_p12), -1.0, %v1896_v18 }
 0x278   : > { %v1751_v31 = vadd.f32 %v1725_v61, %v1687_v43  ;;  %v1898_v43 = vmul.f32 (!%p2265_p12), %v4088_v63, %v1881_v3  ;;  %v1958_v61 = vand.u32 (!%p2265_p12), 2147483647, %v2269_v23 }
 0x279   : > { %1863 = vst.msk [vmem:[#allocation3 + $0x48] sm:$0xff] %vm1757_vm2, %v1847_v33  ;;  %v1899_v33 = vmul.f32 (!%p2265_p12), %v4088_v63, %v1882_v8 }
 0x27a   : > { %1768 = vst.msk [vmem:[#allocation2 + $0x50] sm:$0xff] %vm1757_vm2, %v1751_v31  ;;  %v2272_v31 = vadd.f32 (!%p2265_p12), -1.0, %v1897_v17 }
 0x27b   : > { %v1822_v10 = vpop.xlane.xlu1 %1821 }
 0x27c   : > { %v1848_v7 = vadd.f32 %v1822_v10, %v1784_v42  ;;  %v1883_v2 = vld [vmem:[#allocation2 + $0x48] sm:$0xff] (!%p2265_p12)  ;;  %v1959_v42 = vand.u32 (!%p2265_p12), 2147483647, %v2270_v20  ;;  %v1971_v10 = vsel (!%p2265_p12), %vm1757_vm2, %v1955_v29, 0.0  ;;  %v1929_v29 = vld [vmem:[#allocation3 + $0x30] sm:$0xff] (!%p2265_p12) }
 0x27e   : > { %1864 = vst.msk [vmem:[#allocation3 + $0x50] sm:$0xff] %vm1757_vm2, %v1848_v7  ;;  %v1972_v7 = vsel (!%p2265_p12), %vm1757_vm2, %v1956_v45, 0.0 }
 0x280   : > { %v1728_v60 = vpop.xlane.xlu0 %1727 }
 0x281   : > { %v1752_v55 = vadd.f32 %v1728_v60, %v1688_v59  ;;  %v1884_v59 = vld [vmem:[#allocation2 + $0x50] sm:$0xff] (!%p2265_p12)  ;;  %v1900_v60 = vmul.f32 (!%p2265_p12), %v4088_v63, %v1883_v2  ;;  %v1944_v2 = vmul.f32 (!%p2265_p12), %v1928_v44, %v4088_v63 }
 0x283   : > { %1769 = vst.msk [vmem:[#allocation2 + $0x58] sm:$0xff] %vm1757_vm2, %v1752_v55  ;;  %v1973_v55 = vadd.f32 (!%p2265_p12), %v1972_v7, %v1971_v10  ;;  %v1945_v10 = vmul.f32 (!%p2265_p12), %v1929_v29, %v4088_v63  ;;  %v2015_v7 = vand.u32 (!%p2265_p12), 2147483647, %v1943_v14 }
 0x284   : > { %v1825_v53 = vpop.xlane.xlu0 %1824 }
 0x285   : > { %v1849_v22 = vadd.f32 %v1825_v53, %v1785_v54  ;;  %v1974_v54 = vsel (!%p2265_p12), %vm1757_vm2, %v1957_v48, 0.0  ;;  %v2273_v53 = vadd.f32 (!%p2265_p12), -1.0, %v1898_v43 }
 0x286   : > { %v1731_v16 = vpop.xlane.xlu1 %1730 }
 0x287   : > { %v1753_v15 = vadd.f32 %v1731_v16, %v1689_v26  ;;  %1865 = vst.msk [vmem:[#allocation3 + $0x58] sm:$0xff] %vm1757_vm2, %v1849_v22  ;;  %v1960_v22 = vand.u32 (!%p2265_p12), 2147483647, %v2271_v21  ;;  %v1976_v16 = vsel (!%p2265_p12), %vm1757_vm2, %v1958_v61, 0.0 }
 0x289   : > { %1770 = vst.msk [vmem:[#allocation2 + $0x60] sm:$0xff] %vm1757_vm2, %v1753_v15  ;;  %v1923_v15 = vld [vmem:[#allocation3] sm:$0xff] (!%p2265_p12) }
 0x28a   : > { %v1828_v35 = vpop.xlane.xlu1 %1827  ;;  %v1885_v26 = vld [vmem:[#allocation2 + $0x58] sm:$0xff] (!%p2265_p12) }
 0x28b   : > { %v1850_v38 = vadd.f32 %v1828_v35, %v1786_v47  ;;  %v1975_v35 = vadd.f32 (!%p2265_p12), %v1974_v54, %v1973_v55 }
 0x28d   : > { %1866 = vst.msk [vmem:[#allocation3 + $0x60] sm:$0xff] %vm1757_vm2, %v1850_v38  ;;  %v1924_v38 = vld [vmem:[#allocation3 + $0x8] sm:$0xff] (!%p2265_p12) }
 0x28f   : > { %v1734_v9 = vpop.xlane.xlu0 %1733 }
 0x290   : > { %v1754_v32 = vadd.f32 %v1734_v9, %v1690_v49  ;;  %v1886_v47 = vld [vmem:[#allocation2 + $0x60] sm:$0xff] (!%p2265_p12)  ;;  %v1925_v49 = vld [vmem:[#allocation3 + $0x10] sm:$0xff] (!%p2265_p12) }
 0x292   : > { %1771 = vst.msk [vmem:[#allocation2 + $0x68] sm:$0xff] %vm1757_vm2, %v1754_v32 }
 0x293   : > { %v1831_v46 = vpop.xlane.xlu0 %1830 }
 0x294   : > { %v1851_v28 = vadd.f32 %v1831_v46, %v1787_v4  ;;  %v1901_v4 = vmul.f32 (!%p2265_p12), %v4088_v63, %v1884_v59  ;;  %v1961_v46 = vand.u32 (!%p2265_p12), 2147483647, %v2272_v31  ;;  %v1930_v31 = vld [vmem:[#allocation3 + $0x38] sm:$0xff] (!%p2265_p12) }
 0x295   : > { %v1737_v25 = vpop.xlane.xlu1 %1736 }
 0x296   : > { %v1755_v37 = vadd.f32 %v1737_v25, %v1691_v41  ;;  %1867 = vst.msk [vmem:[#allocation3 + $0x68] sm:$0xff] %vm1757_vm2, %v1851_v28  ;;  %v2274_v41 = vadd.f32 (!%p2265_p12), -1.0, %v1899_v33  ;;  %v1978_v28 = vsel (!%p2265_p12), %vm1757_vm2, %v1959_v42, 0.0  ;;  %v1902_v25 = vmul.f32 (!%p2265_p12), %v4088_v63, %v1885_v26 }
 0x297   : > { %v2276_v6 = vadd.f32 (!%p2265_p12), -1.0, %v1901_v4  ;;  %v1982_v36 = vsel (!%p2265_p12), %vm1757_vm2, %v1961_v46, 0.0 }
 0x298   : > { %1772 = vst.msk [vmem:[#allocation2 + $0x70] sm:$0xff] %vm1757_vm2, %v1755_v37  ;;  %v2275_v37 = vadd.f32 (!%p2265_p12), -1.0, %v1900_v60  ;;  %v1963_v19 = vand.u32 (!%p2265_p12), 2147483647, %v2274_v41  ;;  %v2277_v58 = vadd.f32 (!%p2265_p12), -1.0, %v1902_v25  ;;  %v2034_v25 = vsel (!%p2265_p12), %vm1757_vm2, %v2015_v7, 0.0 }
 0x299   : > { %v1834_v51 = vpop.xlane.xlu1 %1833  ;;  %v1887_v9 = vld [vmem:[#allocation2 + $0x68] sm:$0xff] (!%p2265_p12)  ;;  %v1965_v45 = vand.u32 (!%p2265_p12), 2147483647, %v2276_v6 }
 0x29a   : > { %v1852_v40 = vadd.f32 %v1834_v51, %v1788_v50  ;;  %v1977_v50 = vadd.f32 (!%p2265_p12), %v1976_v16, %v1975_v35  ;;  %v1926_v51 = vld [vmem:[#allocation3 + $0x18] sm:$0xff] (!%p2265_p12)  ;;  %v1964_v1 = vand.u32 (!%p2265_p12), 2147483647, %v2275_v37  ;;  %v1986_v48 = vsel (!%p2265_p12), %vm1757_vm2, %v1963_v19, 0.0 }
 0x29b   : > { %v1942_v24 = vmul.f32 (!%p2265_p12), %v1926_v51, %v4088_v63  ;;  %v1966_v21 = vand.u32 (!%p2265_p12), 2147483647, %v2277_v58  ;;  %v1990_v16 = vsel (!%p2265_p12), %vm1757_vm2, %v1965_v45, 0.0  ;;  %v1933_v51 = vld [vmem:[#allocation3 + $0x50] sm:$0xff] (!%p2265_p12) }
 0x29c   : > { %1868 = vst.msk [vmem:[#allocation3 + $0x70] sm:$0xff] %vm1757_vm2, %v1852_v40  ;;  %v1740_v57 = vpop.xlane.xlu0 %1739  ;;  %v1939_v40 = vmul.f32 (!%p2265_p12), %v1923_v15, %v4088_v63  ;;  %v1979_v13 = vadd.f32 (!%p2265_p12), %v1978_v28, %v1977_v50  ;;  %v1988_v33 = vsel (!%p2265_p12), %vm1757_vm2, %v1964_v1, 0.0  ;;  %v1946_v15 = vmul.f32 (!%p2265_p12), %v1930_v31, %v4088_v63 }
 0x29d   : > { %v1756_v52 = vadd.f32 %v1740_v57, %v1692_v5  ;;  %1873 = sbr.rel (%p2265_p12) target bundleno = 912 (0x390), region = 75  ;;  %v1962_v5 = vand.u32 (!%p2265_p12), 2147483647, %v2273_v53  ;;  %v1980_v57 = vsel (!%p2265_p12), %vm1757_vm2, %v1960_v22, 0.0  ;;  %v2014_v43 = vand.u32 (!%p2265_p12), 2147483647, %v1942_v24 }
 0x29e   : > { %v1981_v56 = vadd.f32 (!%p2265_p12), %v1980_v57, %v1979_v13  ;;  %v2011_v39 = vand.u32 (!%p2265_p12), 2147483647, %v1939_v40  ;;  %v1931_v53 = vld [vmem:[#allocation3 + $0x40] sm:$0xff] (!%p2265_p12)  ;;  %v1992_v41 = vsel (!%p2265_p12), %vm1757_vm2, %v1966_v21, 0.0  ;;  %v2017_v28 = vand.u32 (!%p2265_p12), 2147483647, %v1945_v10 }
 0x29f   : > { %1773 = vst.msk [vmem:[#allocation2 + $0x78] sm:$0xff] %vm1757_vm2, %v1756_v52  ;;  %v1888_v32 = vld [vmem:[#allocation2 + $0x70] sm:$0xff] (!%p2265_p12)  ;;  %v1940_v52 = vmul.f32 (!%p2265_p12), %v1924_v38, %v4088_v63  ;;  %v1984_v62 = vsel (!%p2265_p12), %vm1757_vm2, %v1962_v5, 0.0  ;;  %v2032_v35 = vsel (!%p2265_p12), %vm1757_vm2, %v2014_v43, 0.0  ;;  %v1947_v46 = vmul.f32 (!%p2265_p12), %v1931_v53, %v4088_v63  ;;  %v1935_v24 = vld [vmem:[#allocation3 + $0x60] sm:$0xff] (!%p2265_p12)  ;;  %v1936_v14 = vld [vmem:[#allocation3 + $0x68] sm:$0xff] (!%p2265_p12) }
 0x2a0   : > { %v1837_v34 = vpop.xlane.xlu0 %1836  ;;  %v1905_v30 = vmul.f32 (!%p2265_p12), %v4088_v63, %v1888_v32  ;;  %v1983_v20 = vadd.f32 (!%p2265_p12), %v1982_v36, %v1981_v56  ;;  %v2027_v42 = vsel (!%p2265_p12), %vm1757_vm2, %v2011_v39, 0.0  ;;  %v1932_v32 = vld [vmem:[#allocation3 + $0x48] sm:$0xff] (!%p2265_p12)  ;;  %v2038_v19 = vsel (!%p2265_p12), %vm1757_vm2, %v2017_v28, 0.0 }
 0x2a1   : > { %v1853_v27 = vadd.f32 %v1837_v34, %v1789_v0  ;;  %v1941_v0 = vmul.f32 (!%p2265_p12), %v1925_v49, %v4088_v63  ;;  %v1903_v34 = vmul.f32 (!%p2265_p12), %v4088_v63, %v1886_v47  ;;  %v2012_v18 = vand.u32 (!%p2265_p12), 2147483647, %v1940_v52 }
 0x2a2   : > { %v1985_v61 = vadd.f32 (!%p2265_p12), %v1984_v62, %v1983_v20  ;;  %v2280_v55 = vadd.f32 (!%p2265_p12), -1.0, %v1905_v30  ;;  %v2016_v47 = vand.u32 (!%p2265_p12), 2147483647, %v1944_v2  ;;  %v1948_v57 = vmul.f32 (!%p2265_p12), %v1932_v32, %v4088_v63  ;;  %v1934_v30 = vld [vmem:[#allocation3 + $0x58] sm:$0xff] (!%p2265_p12) }
 0x2a3   : > { %1869 = vst.msk [vmem:[#allocation3 + $0x78] sm:$0xff] %vm1757_vm2, %v1853_v27  ;;  %v1904_v27 = vmul.f32 (!%p2265_p12), %v4088_v63, %v1887_v9  ;;  %v2013_v23 = vand.u32 (!%p2265_p12), 2147483647, %v1941_v0  ;;  %v2278_v8 = vadd.f32 (!%p2265_p12), -1.0, %v1903_v34  ;;  %v2028_v59 = vsel (!%p2265_p12), %vm1757_vm2, %v2012_v18, 0.0  ;;  %v1937_v29 = vld [vmem:[#allocation3 + $0x70] sm:$0xff] (!%p2265_p12) }
 0x2a4   : > { %v1987_v26 = vadd.f32 %v1986_v48, %v1985_v61  ;;  %v2029_v22 = vadd.f32 %v2028_v59, %v2027_v42  ;;  %v1969_v37 = vand.u32 2147483647, %v2280_v55  ;;  %v2018_v52 = vand.u32 2147483647, %v1946_v15 }
 0x2a5   : > { %v2279_v17 = vadd.f32 -1.0, %v1904_v27  ;;  %v2030_v60 = vsel %vm1757_vm2, %v2013_v23, 0.0  ;;  %v1967_v54 = vand.u32 2147483647, %v2278_v8  ;;  %v2036_v0 = vsel %vm1757_vm2, %v2016_v47, 0.0 }
 0x2a6   : > { %v1889_v11 = vld [vmem:[#allocation2 + $0x78] sm:$0xff]  ;;  %v1989_v9 = vadd.f32 %v1988_v33, %v1987_v26  ;;  %v2031_v4 = vadd.f32 %v2030_v60, %v2029_v22  ;;  %v2019_v6 = vand.u32 2147483647, %v1947_v46  ;;  %v1998_v1 = vsel %vm1757_vm2, %v1969_v37, 0.0 }
 0x2a7   : > { %v1906_v3 = vmul.f32 %v4088_v63, %v1889_v11  ;;  %v1968_v49 = vand.u32 2147483647, %v2279_v17  ;;  %v1994_v5 = vsel %vm1757_vm2, %v1967_v54, 0.0  ;;  %v1949_v11 = vmul.f32 %v1933_v51, %v4088_v63 }
 0x2a8   : > { %v1991_v50 = vadd.f32 %v1990_v16, %v1989_v9  ;;  %v2033_v40 = vadd.f32 %v2032_v35, %v2031_v4  ;;  %v1950_v56 = vmul.f32 %v1934_v30, %v4088_v63  ;;  %v2020_v44 = vand.u32 2147483647, %v1948_v57 }
 0x2a9   : > { %v2281_v38 = vadd.f32 -1.0, %v1906_v3  ;;  %v1996_v12 = vsel %vm1757_vm2, %v1968_v49, 0.0  ;;  %v2040_v39 = vsel %vm1757_vm2, %v2018_v52, 0.0  ;;  %v1951_v3 = vmul.f32 %v1935_v24, %v4088_v63 }
 0x2aa   : > { %v1993_v27 = vadd.f32 %v1992_v41, %v1991_v50  ;;  %v2035_v13 = vadd.f32 %v2034_v25, %v2033_v40  ;;  %v2021_v8 = vand.u32 2147483647, %v1949_v11  ;;  %v2042_v17 = vsel %vm1757_vm2, %v2019_v6, 0.0  ;;  %v1938_v61 = vld [vmem:[#allocation3 + $0x78] sm:$0xff] }
 0x2ab   : > { %v1970_v34 = vand.u32 2147483647, %v2281_v38  ;;  %v1952_v48 = vmul.f32 %v1936_v14, %v4088_v63  ;;  %v2022_v2 = vand.u32 2147483647, %v1950_v56  ;;  %v2044_v43 = vsel %vm1757_vm2, %v2020_v44, 0.0 }
 0x2ac   : > { %v1995_v36 = vadd.f32 %v1994_v5, %v1993_v27  ;;  %v2037_v58 = vadd.f32 %v2036_v0, %v2035_v13  ;;  %v1953_v31 = vmul.f32 %v1937_v29, %v4088_v63  ;;  %v2023_v42 = vand.u32 2147483647, %v1951_v3 }
 0x2ad   : > { %v2000_v23 = vsel %vm1757_vm2, %v1970_v34, 0.0  ;;  %v2046_v10 = vsel %vm1757_vm2, %v2021_v8, 0.0  ;;  %v1954_v59 = vmul.f32 %v1938_v61, %v4088_v63  ;;  %v2024_v60 = vand.u32 2147483647, %v1952_v48 }
 0x2ae   : > { %v1997_v62 = vadd.f32 %v1996_v12, %v1995_v36  ;;  %v2039_v18 = vadd.f32 %v2038_v19, %v2037_v58  ;;  %v2048_v55 = vsel %vm1757_vm2, %v2022_v2, 0.0  ;;  %v2025_v26 = vand.u32 2147483647, %v1953_v31 }
 0x2af   : > { %v2050_v53 = vsel %vm1757_vm2, %v2023_v42, 0.0  ;;  %v2026_v16 = vand.u32 2147483647, %v1954_v59  ;;  %v2052_v15 = vsel %vm1757_vm2, %v2024_v60, 0.0 }
 0x2b0   : > { %v1999_v20 = vadd.f32 %v1998_v1, %v1997_v62  ;;  %v2041_v45 = vadd.f32 %v2040_v39, %v2039_v18  ;;  %v2054_v35 = vsel %vm1757_vm2, %v2025_v26, 0.0 }
 0x2b1   : > { %v2056_v49 = vsel %vm1757_vm2, %v2026_v16, 0.0 }
 0x2b2   : > { %v2001_v21 = vadd.f32 %v2000_v23, %v1999_v20  ;;  %v2043_v33 = vadd.f32 %v2042_v17, %v2041_v45 }
 0x2b4   : > { %2002 = vadd.xlane.f32.xlu0 %v2001_v21  ;;  %v2045_v7 = vadd.f32 %v2044_v43, %v2043_v33 }
 0x2b6   : > { %v2047_v54 = vadd.f32 %v2046_v10, %v2045_v7 }
 0x2b8   : > { %v2049_v22 = vadd.f32 %v2048_v55, %v2047_v54 }
 0x2ba   : > { %v2051_v47 = vadd.f32 %v2050_v53, %v2049_v22 }
 0x2bc   : > { %v2053_v38 = vadd.f32 %v2052_v15, %v2051_v47 }
 0x2be   : > { %v2055_v9 = vadd.f32 %v2054_v35, %v2053_v38 }
 0x2c0   : > { %v2057_v32 = vadd.f32 %v2056_v49, %v2055_v9 }
 0x2c2   : > { %2058 = vadd.xlane.f32.xlu0 %v2057_v32 }
 0x341   : > { %v2003_v63 = vpop.xlane.xlu0 %2002 }
 0x342   : > { %v2004_v4 = vrot.slane %v2003_v63, 4 }
 0x344   : > { %v2005_v41 = vadd.f32 %v2004_v4, %v2003_v63 }
 0x346   : > { %v2006_v46 = vrot.slane %v2005_v41, 2 }
 0x348   : > { %v2007_v28 = vadd.f32 %v2006_v46, %v2005_v41 }
 0x34a   : > { %v2008_v25 = vrot.slane %v2007_v28, 1 }
 0x34c   : > { %v2009_v37 = vadd.f32 %v2008_v25, %v2007_v28 }
 0x34e   : > { %2295 = vpush %v2009_v37 }
 0x34f   : > { %v2059_v50 = vpop.xlane.xlu0 %2058 }
 0x350   : > { %v2060_v51 = vrot.slane %v2059_v50, 4 }
 0x352   : > { %v2061_v40 = vadd.f32 %v2060_v51, %v2059_v50 }
 0x354   : > { %v2062_v5 = vrot.slane %v2061_v40, 2 }
 0x356   : > { %v2063_v57 = vadd.f32 %v2062_v5, %v2061_v40 }
 0x358   : > { %v2064_v52 = vrot.slane %v2063_v57, 1 }
 0x35a   : > { %v2065_v0 = vadd.f32 %v2064_v52, %v2063_v57 }
 0x35c   : > { %2297 = vpush %v2065_v0 }
 0x37f   : > { %s2296_s23 = spop %2295 }
 0x380   : > { %v2067_v34 = vstv %s2296_s23 }
 0x381   : > { %2068 = vst [vmem:[%s2775_s26] sm:$0x1] %v2067_v34 }
 0x38d   : > { %s2298_s7 = spop %2297 }
 0x38e   : > { %v2069_v27 = vstv %s2298_s7 }
 0x38f   : > { %2070 = vst [vmem:[%s2775_s26 + $0x1] sm:$0x1] %v2069_v27 }
 0x390 PF: > { %s2283_s16 = sshll.u32 %s2583_s24, 5  ;;  %s2085_s0 = sshll.u32 %s2775_s26, 4  ;;  %s2086_s0 = int_to_ptr.vmem [resolvable:$true] %s2085_s0 }
 0x391   : > { %s4160_s10 = scalar_lea.hbm %s4221_s5, %s2283_s16  ;;  %s2072_s6 = scalar_lea.sflag [#allocation5], %s320_s30 }
 0x392   : > { %s2481_s29 = scalar_lea.vmem %s2086_s0, 32  ;;  %p4520_p2 = scmp.ne.s32.totalorder %s4310_s13, 0 }
 0x393   : > { %p2482_p1 = scmp.ne.s32.totalorder %s2086_s0, %s2481_s29  ;;  %s2601_s4 = smov [#allocation8]  }
 0x394   : > { %s2485_s9 = sshll.u32 %s2601_s4, 4  ;;  %s2486_s9 = int_to_ptr.vmem [resolvable:$false] %s2485_s9 }
 0x395   : > { %p2483_p4 = pnand %p2482_p1, %p4520_p2  ;;  %s2487_s17 = scalar_lea.vmem %s2486_s9, 64 }
 0x396   : > { %p2488_p6 = scmp.lt.s32.totalorder %s2086_s0, %s2486_s9  ;;  %p2489_p7 = scmp.lt.s32.totalorder %s2487_s17, %s2481_s29 }
 0x397   : > { %p2484_p5 = pneg %p2483_p4 }
 0x398   : > { %p2490_p8 = por %p2489_p7, %p2488_p6 }
 0x39a   : > { %p2491_p9 = pnand %p2490_p8, %p2484_p5 }
 0x39c   : > { %2494 = shalt.err (!%p2491_p9)
}
 0x39d   : > { %s2495_s24 = scalar_lea.hbm %s4160_s10, 32  ;;  %s2499_s28 = scalar_lea.hbm %s4221_s5, 128 }
 0x39e   : > { %p2496_p11 = scmp.ne.s32.totalorder %s4160_s10, %s2495_s24  ;;  %p2500_p3 = scmp.lt.u32.totalorder %s4160_s10, %s4221_s5 }
 0x39f   : > { %p2501_p10 = scmp.lt.u32.totalorder %s2499_s28, %s2495_s24  ;;  %p2503_p1 = scmp.lt.u32.totalorder %s2495_s24, %s4160_s10 }
 0x3a0   : > { %p2497_p13 = pnand %p2496_p11, %p4520_p2 }
 0x3a1   : > { %p2502_p12 = por %p2501_p10, %p2500_p3 }
 0x3a2   : > { %p2498_p0 = pneg %p2497_p13 }
 0x3a3   : > { %p2504_p4 = por %p2503_p1, %p2502_p12 }
 0x3a5   : > { %p2505_p5 = pnand %p2504_p4, %p2498_p0 }
 0x3a7   : > { %2508 = shalt.err (!%p2505_p5)
}
 0x3a8   : > { %2303 = dma.vmem_to_hbm [thread:$0]  (%p4520_p2), %s2086_s0, 32, %s4160_s10, %s2072_s6  }
 0x3a9 PF: > { %p2315_p6 = scmp.ge.s32.totalorder %s2595_s27, 2  ;;  %s2097_s7 = sand.u32 1, %s2559_s18  }
 0x3aa   : > { %p4521_p7 = scmp.ne.s32.totalorder %s4311_s15, 0  ;;  %s2098_s16 = scalar_lea.sflag [#allocation5], %s2097_s7 }
 0x3ac   : > { %p2310_p8 = pnand %p2315_p6, %p4521_p7 }
 0x3ae   : > { %2554 = dma.done.wait (!%p2310_p8), %s2098_s16, 32  }
 0x3af   : > { %2556 = vsyncadd (!%p2310_p8), %s2098_s16, 4294967264  ;;  %s19_s27 = sadd.s32 1, %s2595_s27   ;;  %s4522_s24 = sld [smem:[#allocation11_spill]] }
 0x3b0   : > { %p16_p9 = scmp.ge.s32.totalorder %s19_s27, 10   ;;  %s4523_s13 = sld [smem:[#allocation12_spill]] }
 0x3b1   : > { %s4524_s26 = sld [smem:[#allocation13_spill]]  ;;  %s4525_s18 = smov %s2563_s19 }
 0x3b2   : > { %s4526_s19 = smov %s2567_s20  ;;  %s4527_s20 = smov %s2716_s14 }
 0x3b3   : > { %s4528_s21 = smov %s2575_s22  ;;  %s4529_s22 = smov %s2705_s11 }
 0x3b4   : > { %s4530_s23 = smov %s2587_s25  ;;  %18 = sbr.rel (!%p16_p9) target bundleno = 10 (0xa), region = 125 }
 0x3b6   : > { %s4531_s25 = smov %s4523_s13 }
 0x3bb   :  { %2103 = vsyncpa [#allocation5], 1 }
 0x3bc   :  { %2105 = vsyncpa [#allocation5 + $0x1], 1 }
 0x3bd   :  { %2106 = vsyncpa [#allocation6], 1 }
 0x3be   :  { %2108 = vsyncpa [#allocation6 + $0x1], 1 }

</bundles_post_ra>
